<compile_context>
chip_gen: v7x
topology: tpu7x:2x2x1
jax: 0.10.0
libtpu: 0.0.40
codegen_flags: <defaults>
</compile_context>

<pallas_src>
import jax
import jax.numpy as jnp
import numpy as np
from jax.experimental import pallas as pl
from jax.experimental.pallas import tpu as pltpu


_LANES = 128               # lane width of one vreg row
_ROW_TILE_MAX = 2048       # rows per tile cap even on 128 MiB-VMEM chips
_PALLAS_MIN_ROWS = 128     # below this, plain jnp (launch overhead > math)
_SUPPORTED_LOSSES = ('celoss', 'sigmoidfocalloss', 'binaryceloss')


def _round_up(x, m):
    return ((x + m - 1) // m) * m


def _cdiv(a, b):
    return -(-a // b)


# ----------------------------- in-kernel folding ---------------------------- #

def _fold_sublanes(a, rows):
    """(rows, w) with rows % 8 == 0 -> (8, w) partial sums via VALU adds."""
    if rows == 8:
        return a
    acc = a[0:8, :]
    for g in range(1, rows // 8):
        acc = acc + a[g * 8:(g + 1) * 8, :]
    return acc


def _fold_tile(a, rows, cols, lane8):
    """(rows, cols) f32 -> (8, 128) partial sums (sum preserved)."""
    if cols % _LANES == 0:
        acc = a[:, 0:_LANES]
        for g in range(1, cols // _LANES):
            acc = acc + a[:, g * _LANES:(g + 1) * _LANES]
        return _fold_sublanes(acc, rows)
    # non-lane-aligned class dim: lane reduce, then scatter into lane 0
    col = jnp.sum(a, axis=-1, keepdims=True)          # (rows, 1)
    col8 = _fold_sublanes(col, rows)                  # (8, 1)
    return jnp.where(lane8 == 0, col8, 0.0)


# ----------------------------- fused Pallas kernel -------------------------- #

def _build_fused_kernel(entry_meta, *, tile_n, num_classes, n_true, grid_tiles):
    """entry_meta: tuple of (target_is_labels, losses); losses is a tuple of
    (loss_type, scale_factor, opts_dict).  Kernel args:
    [pred_0, tgt_0, pred_1, tgt_1, ..., out]."""
    c = num_classes
    ragged = (grid_tiles * tile_n != n_true)

    def kernel(*refs):
        out_ref = refs[-1]
        in_refs = refs[:-1]
        pid = pl.program_id(0)
        lane8 = jax.lax.broadcasted_iota(jnp.int32, (8, _LANES), 1)

        if ragged:
            row_ids = pid * tile_n + jax.lax.broadcasted_iota(
                jnp.int32, (tile_n, 1), 0)
            row_valid = row_ids < n_true                      # (tile_n, 1) bool

        ref_i = 0
        for idx, (target_is_labels, losses) in enumerate(entry_meta):
            # inputs stream in their native dtype; cast to f32 per tile
            x = in_refs[ref_i][...].astype(jnp.float32)       # (tile_n, C)
            ref_i += 1
            targ_ref = in_refs[ref_i]
            ref_i += 1
            if ragged:
                # mask BEFORE exp/max: OOB tail rows hold undefined data
                x = jnp.where(row_valid, x, 0.0)

            if target_is_labels:
                lbl = targ_ref[...]                           # (tile_n, 1) int32
                cls_mask = (jax.lax.broadcasted_iota(
                    jnp.int32, (tile_n, c), 1) == lbl)        # bool one-hot mask
                t = None
            else:
                t = targ_ref[...].astype(jnp.float32)         # (tile_n, C)
                if ragged:
                    t = jnp.where(row_valid, t, 0.0)
                cls_mask = None

            acc = jnp.zeros((8, _LANES), jnp.float32)

            # shared sub-expressions for the sigmoid-family losses
            needs_sigmoid = any(
                lt in ('sigmoidfocalloss', 'binaryceloss') for lt, _, _ in losses)
            if needs_sigmoid:
                e = jnp.exp(-jnp.abs(x))                      # EUP #1
                one_p_e = 1.0 + e
                log_one_p_e = jnp.log(one_p_e)                # EUP #2 (~log1p)
                if target_is_labels:
                    bce = (jnp.maximum(x, 0.0)
                           - jnp.where(cls_mask, x, 0.0) + log_one_p_e)
                else:
                    bce = jnp.maximum(x, 0.0) - x * t + log_one_p_e
                if ragged:
                    bce = jnp.where(row_valid, bce, 0.0)

            for loss_type, scale, opts in losses:
                if loss_type == 'celoss':
                    m = jnp.max(x, axis=-1, keepdims=True)
                    lse = m + jnp.log(
                        jnp.sum(jnp.exp(x - m), axis=-1, keepdims=True))
                    if target_is_labels:
                        picked = jnp.sum(jnp.where(cls_mask, x, 0.0),
                                         axis=-1, keepdims=True)
                    else:
                        picked = jnp.sum(t * x, axis=-1, keepdims=True)
                    per = lse - picked                        # (tile_n, 1)
                    if ragged:
                        per = jnp.where(row_valid, per, 0.0)
                    col8 = _fold_sublanes(per, tile_n) * (scale / float(n_true))
                    acc = acc + jnp.where(lane8 == 0, col8, 0.0)
                elif loss_type == 'sigmoidfocalloss':
                    gamma = float(opts.get('gamma', 2.0))
                    alpha = float(opts.get('alpha', 0.25))
                    inv = pl.reciprocal(one_p_e, approx=True)  # cheap EUP
                    p = jnp.where(x >= 0.0, inv, e * inv)      # sigmoid(x)
                    if target_is_labels:
                        one_m_pt = jnp.where(cls_mask, 1.0 - p, p)
                        alpha_t = jnp.where(cls_mask, alpha, 1.0 - alpha)
                    else:
                        one_m_pt = 1.0 - (p * t + (1.0 - p) * (1.0 - t))
                        alpha_t = alpha * t + (1.0 - alpha) * (1.0 - t)
                    if gamma == 2.0:
                        mod = one_m_pt * one_m_pt
                    elif gamma == 1.0:
                        mod = one_m_pt
                    elif gamma == 0.0:
                        mod = None
                    else:
                        mod = jnp.power(one_m_pt, gamma)
                    loss = bce * alpha_t if mod is None else bce * mod * alpha_t
                    folded = _fold_tile(loss, tile_n, c, lane8)
                    acc = acc + folded * (scale / float(n_true * c))
                elif loss_type == 'binaryceloss':
                    folded = _fold_tile(bce, tile_n, c, lane8)
                    acc = acc + folded * (scale / float(n_true * c))
                else:
                    raise AssertionError('unsupport loss type %s...' % loss_type)

            # dense (8,128) store of this entry's scaled partial-sum block
            out_ref[0, idx] = acc

    return kernel


# ----------------------------- tiling / dispatch ---------------------------- #

def _pick_tile(n, c, in_bytes_per_row):
    try:
        vmem_bytes = int(pltpu.get_tpu_info().vmem_capacity_bytes)
    except Exception:
        vmem_bytes = 64 * 1024 * 1024          # conservative (v7x per-TC)
    # VMEM budget: double-buffered input tiles + ~12 live f32 (tile_n, C)
    # temporaries for the entry currently being evaluated.
    budget = min(int(vmem_bytes * 0.45), 48 * 1024 * 1024)
    per_row = 2 * in_bytes_per_row + 12 * c * 4
    tile_cap = max(8, budget // per_row)
    tile_cap = min(tile_cap, _ROW_TILE_MAX)
    tile_n = min(tile_cap, _round_up(n, 8))
    tile_n = max(8, _round_up(tile_n, 8))
    # ensure >= 2 grid steps so the "parallel" row axis splits across both
    # v7x TensorCores (one extra ~0.35us step on single-TC chips: negligible)
    if n > 16 and _cdiv(n, tile_n) < 2:
        tile_n = _round_up(_cdiv(n, 2), 8)
    grid_n = _cdiv(n, tile_n)
    vmem_limit = min(int(vmem_bytes * 3 // 4), 96 * 1024 * 1024)
    return tile_n, grid_n, vmem_limit


def _is_label_target(target, n, c):
    if not jnp.issubdtype(target.dtype, jnp.integer):
        return False
    if target.ndim == 1:
        return True
    return target.ndim == 2 and target.shape[1] == 1 and c > 1


def _losses_jnp(entries, n, c):
    """Plain-jnp path for tiny shapes (Pallas launch overhead > the math)."""
    out = []
    for ent in entries:
        x = ent['pred'].astype(jnp.float32)
        target = ent['target']
        if _is_label_target(target, n, c):
            t = jax.nn.one_hot(jnp.reshape(target, (n,)).astype(jnp.int32), c,
                               dtype=jnp.float32)
        else:
            t = target.astype(jnp.float32)
        total = jnp.float32(0.0)
        for loss_type, scale, opts in ent['losses']:
            if loss_type == 'celoss':
                val = jnp.mean(jax.nn.logsumexp(x, axis=-1)
                               - jnp.sum(t * x, axis=-1))
            elif loss_type in ('sigmoidfocalloss', 'binaryceloss'):
                bce = (jnp.maximum(x, 0.0) - x * t
                       + jnp.log1p(jnp.exp(-jnp.abs(x))))
                if loss_type == 'sigmoidfocalloss':
                    gamma = float(opts.get('gamma', 2.0))
                    alpha = float(opts.get('alpha', 0.25))
                    p = jax.nn.sigmoid(x)
                    p_t = p * t + (1.0 - p) * (1.0 - t)
                    a_t = alpha * t + (1.0 - alpha) * (1.0 - t)
                    bce = bce * jnp.power(1.0 - p_t, gamma) * a_t
                val = jnp.mean(bce)
            else:
                raise AssertionError('unsupport loss type %s...' % loss_type)
            total = total + scale * val
        out.append(total)
    return out


def _fused_losses(entries):
    """entries: list of {'pred': (N,C), 'target': labels (N,)/(N,1) int or
    dense (N,C), 'losses': [(type, scale, opts), ...]} sharing one (N, C).
    Returns one scalar f32 loss per entry, computed by a single pallas_call."""
    n, c = entries[0]['pred'].shape
    for ent in entries:
        assert tuple(ent['pred'].shape) == (n, c)

    if n < _PALLAS_MIN_ROWS:
        return _losses_jnp(entries, n, c)

    prepared = []
    in_bytes_per_row = 0
    for ent in entries:
        pred = ent['pred']
        target = ent['target']
        is_labels = _is_label_target(target, n, c)
        if is_labels:
            tgt = jnp.reshape(target, (n, 1)).astype(jnp.int32)
        else:
            assert tuple(target.shape) == (n, c)
            tgt = target
        prepared.append((pred, tgt, is_labels, tuple(ent['losses'])))
        in_bytes_per_row += (c * pred.dtype.itemsize
                             + tgt.shape[1] * tgt.dtype.itemsize)

    tile_n, grid_n, vmem_limit = _pick_tile(n, c, in_bytes_per_row)

    in_arrays, in_specs, entry_meta = [], [], []
    for pred, tgt, is_labels, losses in prepared:
        in_arrays.append(pred)                       # native dtype, no upcast
        in_specs.append(pl.BlockSpec((tile_n, c), lambda i: (i, 0)))
        in_arrays.append(tgt)
        tcols = tgt.shape[1]
        in_specs.append(pl.BlockSpec((tile_n, tcols), lambda i: (i, 0)))
        entry_meta.append((is_labels, losses))

    kernel = _build_fused_kernel(
        tuple(entry_meta), tile_n=tile_n, num_classes=c, n_true=n,
        grid_tiles=grid_n)

    num_entries = len(entries)
    n_terms = sum(len(ls) for _, ls in entry_meta)
    bytes_accessed = (sum(int(a.size) * a.dtype.itemsize for a in in_arrays)
                      + grid_n * num_entries * 8 * _LANES * 4)
    cost = pl.CostEstimate(flops=int(20 * n * c * max(n_terms, 1)),
                           transcendentals=int(3 * n * c * num_entries),
                           bytes_accessed=int(bytes_accessed))

    partials = pl.pallas_call(
        kernel,
        out_shape=jax.ShapeDtypeStruct((grid_n, num_entries, 8, _LANES),
                                       jnp.float32),
        grid=(grid_n,),
        in_specs=in_specs,
        out_specs=pl.BlockSpec((1, num_entries, 8, _LANES),
                               lambda i: (i, 0, 0, 0)),
        compiler_params=pltpu.CompilerParams(
            dimension_semantics=("parallel",),
            vmem_limit_bytes=vmem_limit),
        cost_estimate=cost,
    )(*in_arrays)

    per_entry = jnp.sum(partials, axis=(0, 2, 3))     # (num_entries,)
    return [per_entry[i] for i in range(num_entries)]


# --------------------- BaseModel loss-pipeline equivalent ------------------- #

def celoss(prediction, target, scale_factor=1.0, **opts):
    return _fused_losses([{'pred': prediction, 'target': target,
                           'losses': [('celoss', float(scale_factor),
                                       dict(opts))]}])[0]


def sigmoidfocalloss(prediction, target, scale_factor=1.0, **opts):
    return _fused_losses([{'pred': prediction, 'target': target,
                           'losses': [('sigmoidfocalloss', float(scale_factor),
                                       dict(opts))]}])[0]


def binaryceloss(prediction, target, scale_factor=1.0, **opts):
    return _fused_losses([{'pred': prediction, 'target': target,
                           'losses': [('binaryceloss', float(scale_factor),
                                       dict(opts))]}])[0]


def calculateloss(prediction, target, loss_cfg):
    """All loss terms for one (prediction, target) pair fused in one kernel."""
    losses = []
    for key, value in loss_cfg.items():
        assert key in _SUPPORTED_LOSSES, 'unsupport loss type %s...' % key
        losses.append((key, float(value['scale_factor']),
                       dict(value.get('opts', {}))))
    return _fused_losses([{'pred': prediction, 'target': target,
                           'losses': losses}])[0]


def calculatelosses(predictions, targets, losses_cfg):
    """Mirror of BaseModel.calculatelosses: every loss branch that shares an
    (N, C) prediction shape is fused into a single pallas_call."""
    assert len(predictions) == len(targets) and len(targets) == len(losses_cfg)

    groups = {}
    for loss_name, loss_cfg in losses_cfg.items():
        pred = predictions[loss_name]
        losses = []
        for key, value in loss_cfg.items():
            assert key in _SUPPORTED_LOSSES, 'unsupport loss type %s...' % key
            losses.append((key, float(value['scale_factor']),
                           dict(value.get('opts', {}))))
        groups.setdefault(tuple(pred.shape), []).append(
            (loss_name, {'pred': pred, 'target': targets[loss_name],
                         'losses': losses}))

    results = {}
    for _, named_entries in groups.items():
        names = [name for name, _ in named_entries]
        vals = _fused_losses([ent for _, ent in named_entries])
        results.update(dict(zip(names, vals)))

    losses_log_dict = {}
    loss = jnp.float32(0.0)
    for loss_name in losses_cfg:
        value = jnp.mean(results[loss_name])       # scalar; mirrors .mean()
        loss = loss + value
        losses_log_dict[loss_name] = value
    losses_log_dict['total'] = loss
    # TODO(synk): dist.all_reduce of the log dict has no Pallas equivalent here.
    return loss, losses_log_dict


# ---------------------------------- main ------------------------------------ #

if __name__ == "__main__":
    key = jax.random.PRNGKey(0)
    k1, k2, k3, k4, k5 = jax.random.split(key, 5)

    # N proposals (intentionally not a multiple of the row tile -> exercises
    # the ragged last-tile masking), C classes (lane-aligned).
    N, C = 300, 128

    # Logits stream in their native bf16 (f32 cast happens in-kernel); CE /
    # focal targets are integer labels (no dense one-hot HBM stream).
    cls_logits = jax.random.normal(k1, (N, C), dtype=jnp.float32).astype(jnp.bfloat16)
    cls_labels = jax.random.randint(k2, (N,), 0, C, dtype=jnp.int32)
    focal_logits = jax.random.normal(k5, (N, C), dtype=jnp.float32).astype(jnp.bfloat16)
    bce_logits = jax.random.normal(k3, (N, C), dtype=jnp.float32).astype(jnp.bfloat16)
    bce_targets = jax.random.bernoulli(k4, 0.3, (N, C)).astype(jnp.float32)

    predictions = {'loss_cls': cls_logits,
                   'loss_focal': focal_logits,
                   'loss_bce': bce_logits}
    targets = {'loss_cls': cls_labels,
               'loss_focal': cls_labels,
               'loss_bce': bce_targets}
    losses_cfg = {
        'loss_cls': {'celoss': {'scale_factor': 1.0, 'opts': {}}},
        'loss_focal': {'sigmoidfocalloss': {
            'scale_factor': 1.0, 'opts': {'gamma': 2.0, 'alpha': 0.25}}},
        'loss_bce': {'binaryceloss': {'scale_factor': 1.0, 'opts': {}}},
    }

    total_loss, log_dict = calculatelosses(predictions, targets, losses_cfg)
    total_loss = jax.block_until_ready(total_loss)
    log_dict = jax.block_until_ready(log_dict)

    # pure-JAX reference check
    def _ref_total():
        oh = jax.nn.one_hot(cls_labels, C, dtype=jnp.float32)

        x_cls = cls_logits.astype(jnp.float32)
        ce = jnp.mean(jax.nn.logsumexp(x_cls, axis=-1)
                      - jnp.sum(oh * x_cls, axis=-1))

        x_f = focal_logits.astype(jnp.float32)
        p = jax.nn.sigmoid(x_f)
        bce_f = (jnp.maximum(x_f, 0.0) - x_f * oh
                 + jnp.log1p(jnp.exp(-jnp.abs(x_f))))
        p_t = p * oh + (1.0 - p) * (1.0 - oh)
        a_t = 0.25 * oh + 0.75 * (1.0 - oh)
        focal = jnp.mean(bce_f * (1.0 - p_t) ** 2 * a_t)

        x_b = bce_logits.astype(jnp.float32)
        bce = jnp.mean(jnp.maximum(x_b, 0.0) - x_b * bce_targets
                       + jnp.log1p(jnp.exp(-jnp.abs(x_b))))
        return ce + focal + bce

    ref = _ref_total()
    assert jnp.isfinite(total_loss)
    np.testing.assert_allclose(np.asarray(total_loss), np.asarray(ref),
                               rtol=5e-2, atol=1e-3)
    print("KERNEL_OK")
</pallas_src>

<mosaic_0001>
module attributes {stable_mosaic.version = 11 : i64} {
  func.func @kernel(%arg0: i32, %arg1: memref<152x128xbf16, #tpu.memory_space<vmem>>, %arg2: memref<152x1xi32, #tpu.memory_space<vmem>>, %arg3: memref<152x128xbf16, #tpu.memory_space<vmem>>, %arg4: memref<152x1xi32, #tpu.memory_space<vmem>>, %arg5: memref<152x128xbf16, #tpu.memory_space<vmem>>, %arg6: memref<152x128xf32, #tpu.memory_space<vmem>>, %arg7: memref<1x3x8x128xf32, #tpu.memory_space<vmem>>) attributes {dimension_semantics = [#tpu.dimension_semantics<parallel>], iteration_bounds = array<i64: 2>, scalar_prefetch = 0 : i64, scratch_operands = 0 : i64, tpu.core_type = #tpu.core_type<tc>, window_params = [{transform_indices = @transform_0, window_bounds = array<i64: 152, 128>}, {transform_indices = @transform_1, window_bounds = array<i64: 152, 1>}, {transform_indices = @transform_2, window_bounds = array<i64: 152, 128>}, {transform_indices = @transform_3, window_bounds = array<i64: 152, 1>}, {transform_indices = @transform_4, window_bounds = array<i64: 152, 128>}, {transform_indices = @transform_5, window_bounds = array<i64: 152, 128>}, {transform_indices = @transform_6, window_bounds = array<i64: 1, 3, 8, 128>}]} {
    %0 = tpu.iota {dimensions = array<i32: 1>} : vector<8x128xi32>
    %c152_i32 = arith.constant 152 : i32
    %1 = arith.muli %arg0, %c152_i32 : i32
    %2 = tpu.iota {dimensions = array<i32: 0>} : vector<152x1xi32>
    %3 = vector.broadcast %1 : i32 to vector<152x1xi32>
    %4 = arith.addi %3, %2 : vector<152x1xi32>
    %c300_i32 = arith.constant 300 : i32
    %5 = vector.broadcast %c300_i32 : i32 to vector<152x1xi32>
    %6 = arith.cmpi slt, %4, %5 : vector<152x1xi32>
    %c0 = arith.constant 0 : index
    %c0_0 = arith.constant 0 : index
    %7 = vector.load %arg1[%c0, %c0_0] : memref<152x128xbf16, #tpu.memory_space<vmem>>, vector<152x128xbf16>
    %8 = arith.extf %7 : vector<152x128xbf16> to vector<152x128xf32>
    %cst = arith.constant 0.000000e+00 : f32
    %9 = vector.shape_cast %6 : vector<152x1xi1> to vector<152x1xi1>
    %10 = vector.broadcast %9 : vector<152x1xi1> to vector<152x128xi1>
    %11 = vector.broadcast %cst : f32 to vector<152x128xf32>
    %12 = arith.select %10, %8, %11 : vector<152x128xi1>, vector<152x128xf32>
    %c0_1 = arith.constant 0 : index
    %c0_2 = arith.constant 0 : index
    %13 = vector.load %arg2[%c0_1, %c0_2] : memref<152x1xi32, #tpu.memory_space<vmem>>, vector<152x1xi32>
    %14 = tpu.iota {dimensions = array<i32: 1>} : vector<152x128xi32>
    %15 = vector.broadcast %13 : vector<152x1xi32> to vector<152x128xi32>
    %16 = arith.cmpi eq, %14, %15 : vector<152x128xi32>
    %cst_3 = arith.constant 0.000000e+00 : f32
    %17 = vector.broadcast %cst_3 : f32 to vector<8x128xf32>
    %cst_4 = arith.constant dense<0xFF800000> : vector<152xf32>
    %18 = vector.multi_reduction <maximumf>, %12, %cst_4 [1] : vector<152x128xf32> to vector<152xf32>
    %19 = vector.shape_cast %18 : vector<152xf32> to vector<152x1xf32>
    %20 = vector.broadcast %19 : vector<152x1xf32> to vector<152x128xf32>
    %21 = arith.subf %12, %20 : vector<152x128xf32>
    %22 = math.exp %21 : vector<152x128xf32>
    %cst_5 = arith.constant dense<0.000000e+00> : vector<152xf32>
    %23 = vector.multi_reduction <add>, %22, %cst_5 [1] : vector<152x128xf32> to vector<152xf32>
    %24 = vector.shape_cast %23 : vector<152xf32> to vector<152x1xf32>
    %25 = math.log %24 : vector<152x1xf32>
    %26 = arith.addf %19, %25 : vector<152x1xf32>
    %cst_6 = arith.constant 0.000000e+00 : f32
    %27 = vector.broadcast %cst_6 : f32 to vector<152x128xf32>
    %28 = arith.select %16, %12, %27 : vector<152x128xi1>, vector<152x128xf32>
    %cst_7 = arith.constant dense<0.000000e+00> : vector<152xf32>
    %29 = vector.multi_reduction <add>, %28, %cst_7 [1] : vector<152x128xf32> to vector<152xf32>
    %30 = vector.shape_cast %29 : vector<152xf32> to vector<152x1xf32>
    %31 = arith.subf %26, %30 : vector<152x1xf32>
    %cst_8 = arith.constant 0.000000e+00 : f32
    %32 = vector.broadcast %cst_8 : f32 to vector<152x1xf32>
    %33 = arith.select %6, %31, %32 : vector<152x1xi1>, vector<152x1xf32>
    %34 = vector.extract_strided_slice %33 {offsets = [0, 0], sizes = [8, 1], strides = [1, 1]} : vector<152x1xf32> to vector<8x1xf32>
    %35 = vector.extract_strided_slice %33 {offsets = [8, 0], sizes = [8, 1], strides = [1, 1]} : vector<152x1xf32> to vector<8x1xf32>
    %36 = arith.addf %34, %35 : vector<8x1xf32>
    %37 = vector.extract_strided_slice %33 {offsets = [16, 0], sizes = [8, 1], strides = [1, 1]} : vector<152x1xf32> to vector<8x1xf32>
    %38 = arith.addf %36, %37 : vector<8x1xf32>
    %39 = vector.extract_strided_slice %33 {offsets = [24, 0], sizes = [8, 1], strides = [1, 1]} : vector<152x1xf32> to vector<8x1xf32>
    %40 = arith.addf %38, %39 : vector<8x1xf32>
    %41 = vector.extract_strided_slice %33 {offsets = [32, 0], sizes = [8, 1], strides = [1, 1]} : vector<152x1xf32> to vector<8x1xf32>
    %42 = arith.addf %40, %41 : vector<8x1xf32>
    %43 = vector.extract_strided_slice %33 {offsets = [40, 0], sizes = [8, 1], strides = [1, 1]} : vector<152x1xf32> to vector<8x1xf32>
    %44 = arith.addf %42, %43 : vector<8x1xf32>
    %45 = vector.extract_strided_slice %33 {offsets = [48, 0], sizes = [8, 1], strides = [1, 1]} : vector<152x1xf32> to vector<8x1xf32>
    %46 = arith.addf %44, %45 : vector<8x1xf32>
    %47 = vector.extract_strided_slice %33 {offsets = [56, 0], sizes = [8, 1], strides = [1, 1]} : vector<152x1xf32> to vector<8x1xf32>
    %48 = arith.addf %46, %47 : vector<8x1xf32>
    %49 = vector.extract_strided_slice %33 {offsets = [64, 0], sizes = [8, 1], strides = [1, 1]} : vector<152x1xf32> to vector<8x1xf32>
    %50 = arith.addf %48, %49 : vector<8x1xf32>
    %51 = vector.extract_strided_slice %33 {offsets = [72, 0], sizes = [8, 1], strides = [1, 1]} : vector<152x1xf32> to vector<8x1xf32>
    %52 = arith.addf %50, %51 : vector<8x1xf32>
    %53 = vector.extract_strided_slice %33 {offsets = [80, 0], sizes = [8, 1], strides = [1, 1]} : vector<152x1xf32> to vector<8x1xf32>
    %54 = arith.addf %52, %53 : vector<8x1xf32>
    %55 = vector.extract_strided_slice %33 {offsets = [88, 0], sizes = [8, 1], strides = [1, 1]} : vector<152x1xf32> to vector<8x1xf32>
    %56 = arith.addf %54, %55 : vector<8x1xf32>
    %57 = vector.extract_strided_slice %33 {offsets = [96, 0], sizes = [8, 1], strides = [1, 1]} : vector<152x1xf32> to vector<8x1xf32>
    %58 = arith.addf %56, %57 : vector<8x1xf32>
    %59 = vector.extract_strided_slice %33 {offsets = [104, 0], sizes = [8, 1], strides = [1, 1]} : vector<152x1xf32> to vector<8x1xf32>
    %60 = arith.addf %58, %59 : vector<8x1xf32>
    %61 = vector.extract_strided_slice %33 {offsets = [112, 0], sizes = [8, 1], strides = [1, 1]} : vector<152x1xf32> to vector<8x1xf32>
    %62 = arith.addf %60, %61 : vector<8x1xf32>
    %63 = vector.extract_strided_slice %33 {offsets = [120, 0], sizes = [8, 1], strides = [1, 1]} : vector<152x1xf32> to vector<8x1xf32>
    %64 = arith.addf %62, %63 : vector<8x1xf32>
    %65 = vector.extract_strided_slice %33 {offsets = [128, 0], sizes = [8, 1], strides = [1, 1]} : vector<152x1xf32> to vector<8x1xf32>
    %66 = arith.addf %64, %65 : vector<8x1xf32>
    %67 = vector.extract_strided_slice %33 {offsets = [136, 0], sizes = [8, 1], strides = [1, 1]} : vector<152x1xf32> to vector<8x1xf32>
    %68 = arith.addf %66, %67 : vector<8x1xf32>
    %69 = vector.extract_strided_slice %33 {offsets = [144, 0], sizes = [8, 1], strides = [1, 1]} : vector<152x1xf32> to vector<8x1xf32>
    %70 = arith.addf %68, %69 : vector<8x1xf32>
    %cst_9 = arith.constant 0.00333333341 : f32
    %71 = vector.broadcast %cst_9 : f32 to vector<8x1xf32>
    %72 = arith.mulf %70, %71 : vector<8x1xf32>
    %c0_i32 = arith.constant 0 : i32
    %73 = vector.broadcast %c0_i32 : i32 to vector<8x128xi32>
    %74 = arith.cmpi eq, %0, %73 : vector<8x128xi32>
    %cst_10 = arith.constant 0.000000e+00 : f32
    %75 = vector.shape_cast %72 : vector<8x1xf32> to vector<8x1xf32>
    %76 = vector.broadcast %75 : vector<8x1xf32> to vector<8x128xf32>
    %77 = vector.broadcast %cst_10 : f32 to vector<8x128xf32>
    %78 = arith.select %74, %76, %77 : vector<8x128xi1>, vector<8x128xf32>
    %79 = arith.addf %17, %78 : vector<8x128xf32>
    %c0_11 = arith.constant 0 : index
    %c0_12 = arith.constant 0 : index
    %c0_13 = arith.constant 0 : index
    %c0_14 = arith.constant 0 : index
    %80 = vector.load %arg7[%c0_11, %c0_12, %c0_13, %c0_14] : memref<1x3x8x128xf32, #tpu.memory_space<vmem>>, vector<1x1x8x128xf32>
    %81 = vector.shape_cast %80 : vector<1x1x8x128xf32> to vector<8x128xf32>
    %82 = vector.shape_cast %79 : vector<8x128xf32> to vector<1x1x8x128xf32>
    tpu.vector_store %arg7[%c0_11, %c0_12, %c0_13, %c0_14], %82 {strides = array<i32>} : memref<1x3x8x128xf32, #tpu.memory_space<vmem>>, vector<1x1x8x128xf32>,
    %c0_15 = arith.constant 0 : index
    %c0_16 = arith.constant 0 : index
    %83 = vector.load %arg3[%c0_15, %c0_16] : memref<152x128xbf16, #tpu.memory_space<vmem>>, vector<152x128xbf16>
    %84 = arith.extf %83 : vector<152x128xbf16> to vector<152x128xf32>
    %cst_17 = arith.constant 0.000000e+00 : f32
    %85 = vector.shape_cast %6 : vector<152x1xi1> to vector<152x1xi1>
    %86 = vector.broadcast %85 : vector<152x1xi1> to vector<152x128xi1>
    %87 = vector.broadcast %cst_17 : f32 to vector<152x128xf32>
    %88 = arith.select %86, %84, %87 : vector<152x128xi1>, vector<152x128xf32>
    %c0_18 = arith.constant 0 : index
    %c0_19 = arith.constant 0 : index
    %89 = vector.load %arg4[%c0_18, %c0_19] : memref<152x1xi32, #tpu.memory_space<vmem>>, vector<152x1xi32>
    %90 = tpu.iota {dimensions = array<i32: 1>} : vector<152x128xi32>
    %91 = vector.broadcast %89 : vector<152x1xi32> to vector<152x128xi32>
    %92 = arith.cmpi eq, %90, %91 : vector<152x128xi32>
    %cst_20 = arith.constant 0.000000e+00 : f32
    %93 = vector.broadcast %cst_20 : f32 to vector<8x128xf32>
    %94 = math.absf %88 : vector<152x128xf32>
    %cst_21 = arith.constant 0.000000e+00 : f32
    %95 = vector.broadcast %cst_21 : f32 to vector<152x128xf32>
    %96 = arith.subf %95, %94 : vector<152x128xf32>
    %97 = math.exp %96 : vector<152x128xf32>
    %cst_22 = arith.constant 1.000000e+00 : f32
    %98 = vector.broadcast %cst_22 : f32 to vector<152x128xf32>
    %99 = arith.addf %98, %97 : vector<152x128xf32>
    %100 = math.log %99 : vector<152x128xf32>
    %cst_23 = arith.constant 0.000000e+00 : f32
    %101 = vector.broadcast %cst_23 : f32 to vector<152x128xf32>
    %102 = arith.maximumf %88, %101 : vector<152x128xf32>
    %cst_24 = arith.constant 0.000000e+00 : f32
    %103 = vector.broadcast %cst_24 : f32 to vector<152x128xf32>
    %104 = arith.select %92, %88, %103 : vector<152x128xi1>, vector<152x128xf32>
    %105 = arith.subf %102, %104 : vector<152x128xf32>
    %106 = arith.addf %105, %100 : vector<152x128xf32>
    %cst_25 = arith.constant 0.000000e+00 : f32
    %107 = vector.shape_cast %6 : vector<152x1xi1> to vector<152x1xi1>
    %108 = vector.broadcast %107 : vector<152x1xi1> to vector<152x128xi1>
    %109 = vector.broadcast %cst_25 : f32 to vector<152x128xf32>
    %110 = arith.select %108, %106, %109 : vector<152x128xi1>, vector<152x128xf32>
    %111 = tpu.reciprocal %99 {approx = true} : vector<152x128xf32> -> vector<152x128xf32>
    %cst_26 = arith.constant 0.000000e+00 : f32
    %112 = vector.broadcast %cst_26 : f32 to vector<152x128xf32>
    %113 = arith.cmpf oge, %88, %112 : vector<152x128xf32>
    %114 = arith.mulf %97, %111 : vector<152x128xf32>
    %115 = arith.select %113, %111, %114 : vector<152x128xi1>, vector<152x128xf32>
    %cst_27 = arith.constant 1.000000e+00 : f32
    %116 = vector.broadcast %cst_27 : f32 to vector<152x128xf32>
    %117 = arith.subf %116, %115 : vector<152x128xf32>
    %118 = arith.select %92, %117, %115 : vector<152x128xi1>, vector<152x128xf32>
    %cst_28 = arith.constant 2.500000e-01 : f32
    %cst_29 = arith.constant 7.500000e-01 : f32
    %119 = vector.broadcast %cst_28 : f32 to vector<152x128xf32>
    %120 = vector.broadcast %cst_29 : f32 to vector<152x128xf32>
    %121 = arith.select %92, %119, %120 : vector<152x128xi1>, vector<152x128xf32>
    %122 = arith.mulf %118, %118 : vector<152x128xf32>
    %123 = arith.mulf %110, %122 : vector<152x128xf32>
    %124 = arith.mulf %123, %121 : vector<152x128xf32>
    %125 = vector.extract_strided_slice %124 {offsets = [0, 0], sizes = [8, 128], strides = [1, 1]} : vector<152x128xf32> to vector<8x128xf32>
    %126 = vector.extract_strided_slice %124 {offsets = [8, 0], sizes = [8, 128], strides = [1, 1]} : vector<152x128xf32> to vector<8x128xf32>
    %127 = arith.addf %125, %126 : vector<8x128xf32>
    %128 = vector.extract_strided_slice %124 {offsets = [16, 0], sizes = [8, 128], strides = [1, 1]} : vector<152x128xf32> to vector<8x128xf32>
    %129 = arith.addf %127, %128 : vector<8x128xf32>
    %130 = vector.extract_strided_slice %124 {offsets = [24, 0], sizes = [8, 128], strides = [1, 1]} : vector<152x128xf32> to vector<8x128xf32>
    %131 = arith.addf %129, %130 : vector<8x128xf32>
    %132 = vector.extract_strided_slice %124 {offsets = [32, 0], sizes = [8, 128], strides = [1, 1]} : vector<152x128xf32> to vector<8x128xf32>
    %133 = arith.addf %131, %132 : vector<8x128xf32>
    %134 = vector.extract_strided_slice %124 {offsets = [40, 0], sizes = [8, 128], strides = [1, 1]} : vector<152x128xf32> to vector<8x128xf32>
    %135 = arith.addf %133, %134 : vector<8x128xf32>
    %136 = vector.extract_strided_slice %124 {offsets = [48, 0], sizes = [8, 128], strides = [1, 1]} : vector<152x128xf32> to vector<8x128xf32>
    %137 = arith.addf %135, %136 : vector<8x128xf32>
    %138 = vector.extract_strided_slice %124 {offsets = [56, 0], sizes = [8, 128], strides = [1, 1]} : vector<152x128xf32> to vector<8x128xf32>
    %139 = arith.addf %137, %138 : vector<8x128xf32>
    %140 = vector.extract_strided_slice %124 {offsets = [64, 0], sizes = [8, 128], strides = [1, 1]} : vector<152x128xf32> to vector<8x128xf32>
    %141 = arith.addf %139, %140 : vector<8x128xf32>
    %142 = vector.extract_strided_slice %124 {offsets = [72, 0], sizes = [8, 128], strides = [1, 1]} : vector<152x128xf32> to vector<8x128xf32>
    %143 = arith.addf %141, %142 : vector<8x128xf32>
    %144 = vector.extract_strided_slice %124 {offsets = [80, 0], sizes = [8, 128], strides = [1, 1]} : vector<152x128xf32> to vector<8x128xf32>
    %145 = arith.addf %143, %144 : vector<8x128xf32>
    %146 = vector.extract_strided_slice %124 {offsets = [88, 0], sizes = [8, 128], strides = [1, 1]} : vector<152x128xf32> to vector<8x128xf32>
    %147 = arith.addf %145, %146 : vector<8x128xf32>
    %148 = vector.extract_strided_slice %124 {offsets = [96, 0], sizes = [8, 128], strides = [1, 1]} : vector<152x128xf32> to vector<8x128xf32>
    %149 = arith.addf %147, %148 : vector<8x128xf32>
    %150 = vector.extract_strided_slice %124 {offsets = [104, 0], sizes = [8, 128], strides = [1, 1]} : vector<152x128xf32> to vector<8x128xf32>
    %151 = arith.addf %149, %150 : vector<8x128xf32>
    %152 = vector.extract_strided_slice %124 {offsets = [112, 0], sizes = [8, 128], strides = [1, 1]} : vector<152x128xf32> to vector<8x128xf32>
    %153 = arith.addf %151, %152 : vector<8x128xf32>
    %154 = vector.extract_strided_slice %124 {offsets = [120, 0], sizes = [8, 128], strides = [1, 1]} : vector<152x128xf32> to vector<8x128xf32>
    %155 = arith.addf %153, %154 : vector<8x128xf32>
    %156 = vector.extract_strided_slice %124 {offsets = [128, 0], sizes = [8, 128], strides = [1, 1]} : vector<152x128xf32> to vector<8x128xf32>
    %157 = arith.addf %155, %156 : vector<8x128xf32>
    %158 = vector.extract_strided_slice %124 {offsets = [136, 0], sizes = [8, 128], strides = [1, 1]} : vector<152x128xf32> to vector<8x128xf32>
    %159 = arith.addf %157, %158 : vector<8x128xf32>
    %160 = vector.extract_strided_slice %124 {offsets = [144, 0], sizes = [8, 128], strides = [1, 1]} : vector<152x128xf32> to vector<8x128xf32>
    %161 = arith.addf %159, %160 : vector<8x128xf32>
    %cst_30 = arith.constant 2.60416673E-5 : f32
    %162 = vector.broadcast %cst_30 : f32 to vector<8x128xf32>
    %163 = arith.mulf %161, %162 : vector<8x128xf32>
    %164 = arith.addf %93, %163 : vector<8x128xf32>
    %c0_31 = arith.constant 0 : index
    %c1 = arith.constant 1 : index
    %c0_32 = arith.constant 0 : index
    %c0_33 = arith.constant 0 : index
    %165 = vector.load %arg7[%c0_31, %c1, %c0_32, %c0_33] : memref<1x3x8x128xf32, #tpu.memory_space<vmem>>, vector<1x1x8x128xf32>
    %166 = vector.shape_cast %165 : vector<1x1x8x128xf32> to vector<8x128xf32>
    %167 = vector.shape_cast %164 : vector<8x128xf32> to vector<1x1x8x128xf32>
    tpu.vector_store %arg7[%c0_31, %c1, %c0_32, %c0_33], %167 {strides = array<i32>} : memref<1x3x8x128xf32, #tpu.memory_space<vmem>>, vector<1x1x8x128xf32>,
    %c0_34 = arith.constant 0 : index
    %c0_35 = arith.constant 0 : index
    %168 = vector.load %arg5[%c0_34, %c0_35] : memref<152x128xbf16, #tpu.memory_space<vmem>>, vector<152x128xbf16>
    %169 = arith.extf %168 : vector<152x128xbf16> to vector<152x128xf32>
    %cst_36 = arith.constant 0.000000e+00 : f32
    %170 = vector.shape_cast %6 : vector<152x1xi1> to vector<152x1xi1>
    %171 = vector.broadcast %170 : vector<152x1xi1> to vector<152x128xi1>
    %172 = vector.broadcast %cst_36 : f32 to vector<152x128xf32>
    %173 = arith.select %171, %169, %172 : vector<152x128xi1>, vector<152x128xf32>
    %c0_37 = arith.constant 0 : index
    %c0_38 = arith.constant 0 : index
    %174 = vector.load %arg6[%c0_37, %c0_38] : memref<152x128xf32, #tpu.memory_space<vmem>>, vector<152x128xf32>
    %cst_39 = arith.constant 0.000000e+00 : f32
    %175 = vector.shape_cast %6 : vector<152x1xi1> to vector<152x1xi1>
    %176 = vector.broadcast %175 : vector<152x1xi1> to vector<152x128xi1>
    %177 = vector.broadcast %cst_39 : f32 to vector<152x128xf32>
    %178 = arith.select %176, %174, %177 : vector<152x128xi1>, vector<152x128xf32>
    %cst_40 = arith.constant 0.000000e+00 : f32
    %179 = vector.broadcast %cst_40 : f32 to vector<8x128xf32>
    %180 = math.absf %173 : vector<152x128xf32>
    %cst_41 = arith.constant 0.000000e+00 : f32
    %181 = vector.broadcast %cst_41 : f32 to vector<152x128xf32>
    %182 = arith.subf %181, %180 : vector<152x128xf32>
    %183 = math.exp %182 : vector<152x128xf32>
    %cst_42 = arith.constant 1.000000e+00 : f32
    %184 = vector.broadcast %cst_42 : f32 to vector<152x128xf32>
    %185 = arith.addf %184, %183 : vector<152x128xf32>
    %186 = math.log %185 : vector<152x128xf32>
    %cst_43 = arith.constant 0.000000e+00 : f32
    %187 = vector.broadcast %cst_43 : f32 to vector<152x128xf32>
    %188 = arith.maximumf %173, %187 : vector<152x128xf32>
    %189 = arith.mulf %173, %178 : vector<152x128xf32>
    %190 = arith.subf %188, %189 : vector<152x128xf32>
    %191 = arith.addf %190, %186 : vector<152x128xf32>
    %cst_44 = arith.constant 0.000000e+00 : f32
    %192 = vector.shape_cast %6 : vector<152x1xi1> to vector<152x1xi1>
    %193 = vector.broadcast %192 : vector<152x1xi1> to vector<152x128xi1>
    %194 = vector.broadcast %cst_44 : f32 to vector<152x128xf32>
    %195 = arith.select %193, %191, %194 : vector<152x128xi1>, vector<152x128xf32>
    %196 = vector.extract_strided_slice %195 {offsets = [0, 0], sizes = [8, 128], strides = [1, 1]} : vector<152x128xf32> to vector<8x128xf32>
    %197 = vector.extract_strided_slice %195 {offsets = [8, 0], sizes = [8, 128], strides = [1, 1]} : vector<152x128xf32> to vector<8x128xf32>
    %198 = arith.addf %196, %197 : vector<8x128xf32>
    %199 = vector.extract_strided_slice %195 {offsets = [16, 0], sizes = [8, 128], strides = [1, 1]} : vector<152x128xf32> to vector<8x128xf32>
    %200 = arith.addf %198, %199 : vector<8x128xf32>
    %201 = vector.extract_strided_slice %195 {offsets = [24, 0], sizes = [8, 128], strides = [1, 1]} : vector<152x128xf32> to vector<8x128xf32>
    %202 = arith.addf %200, %201 : vector<8x128xf32>
    %203 = vector.extract_strided_slice %195 {offsets = [32, 0], sizes = [8, 128], strides = [1, 1]} : vector<152x128xf32> to vector<8x128xf32>
    %204 = arith.addf %202, %203 : vector<8x128xf32>
    %205 = vector.extract_strided_slice %195 {offsets = [40, 0], sizes = [8, 128], strides = [1, 1]} : vector<152x128xf32> to vector<8x128xf32>
    %206 = arith.addf %204, %205 : vector<8x128xf32>
    %207 = vector.extract_strided_slice %195 {offsets = [48, 0], sizes = [8, 128], strides = [1, 1]} : vector<152x128xf32> to vector<8x128xf32>
    %208 = arith.addf %206, %207 : vector<8x128xf32>
    %209 = vector.extract_strided_slice %195 {offsets = [56, 0], sizes = [8, 128], strides = [1, 1]} : vector<152x128xf32> to vector<8x128xf32>
    %210 = arith.addf %208, %209 : vector<8x128xf32>
    %211 = vector.extract_strided_slice %195 {offsets = [64, 0], sizes = [8, 128], strides = [1, 1]} : vector<152x128xf32> to vector<8x128xf32>
    %212 = arith.addf %210, %211 : vector<8x128xf32>
    %213 = vector.extract_strided_slice %195 {offsets = [72, 0], sizes = [8, 128], strides = [1, 1]} : vector<152x128xf32> to vector<8x128xf32>
    %214 = arith.addf %212, %213 : vector<8x128xf32>
    %215 = vector.extract_strided_slice %195 {offsets = [80, 0], sizes = [8, 128], strides = [1, 1]} : vector<152x128xf32> to vector<8x128xf32>
    %216 = arith.addf %214, %215 : vector<8x128xf32>
    %217 = vector.extract_strided_slice %195 {offsets = [88, 0], sizes = [8, 128], strides = [1, 1]} : vector<152x128xf32> to vector<8x128xf32>
    %218 = arith.addf %216, %217 : vector<8x128xf32>
    %219 = vector.extract_strided_slice %195 {offsets = [96, 0], sizes = [8, 128], strides = [1, 1]} : vector<152x128xf32> to vector<8x128xf32>
    %220 = arith.addf %218, %219 : vector<8x128xf32>
    %221 = vector.extract_strided_slice %195 {offsets = [104, 0], sizes = [8, 128], strides = [1, 1]} : vector<152x128xf32> to vector<8x128xf32>
    %222 = arith.addf %220, %221 : vector<8x128xf32>
    %223 = vector.extract_strided_slice %195 {offsets = [112, 0], sizes = [8, 128], strides = [1, 1]} : vector<152x128xf32> to vector<8x128xf32>
    %224 = arith.addf %222, %223 : vector<8x128xf32>
    %225 = vector.extract_strided_slice %195 {offsets = [120, 0], sizes = [8, 128], strides = [1, 1]} : vector<152x128xf32> to vector<8x128xf32>
    %226 = arith.addf %224, %225 : vector<8x128xf32>
    %227 = vector.extract_strided_slice %195 {offsets = [128, 0], sizes = [8, 128], strides = [1, 1]} : vector<152x128xf32> to vector<8x128xf32>
    %228 = arith.addf %226, %227 : vector<8x128xf32>
    %229 = vector.extract_strided_slice %195 {offsets = [136, 0], sizes = [8, 128], strides = [1, 1]} : vector<152x128xf32> to vector<8x128xf32>
    %230 = arith.addf %228, %229 : vector<8x128xf32>
    %231 = vector.extract_strided_slice %195 {offsets = [144, 0], sizes = [8, 128], strides = [1, 1]} : vector<152x128xf32> to vector<8x128xf32>
    %232 = arith.addf %230, %231 : vector<8x128xf32>
    %cst_45 = arith.constant 2.60416673E-5 : f32
    %233 = vector.broadcast %cst_45 : f32 to vector<8x128xf32>
    %234 = arith.mulf %232, %233 : vector<8x128xf32>
    %235 = arith.addf %179, %234 : vector<8x128xf32>
    %c0_46 = arith.constant 0 : index
    %c2 = arith.constant 2 : index
    %c0_47 = arith.constant 0 : index
    %c0_48 = arith.constant 0 : index
    %236 = vector.load %arg7[%c0_46, %c2, %c0_47, %c0_48] : memref<1x3x8x128xf32, #tpu.memory_space<vmem>>, vector<1x1x8x128xf32>
    %237 = vector.shape_cast %236 : vector<1x1x8x128xf32> to vector<8x128xf32>
    %238 = vector.shape_cast %235 : vector<8x128xf32> to vector<1x1x8x128xf32>
    tpu.vector_store %arg7[%c0_46, %c2, %c0_47, %c0_48], %238 {strides = array<i32>} : memref<1x3x8x128xf32, #tpu.memory_space<vmem>>, vector<1x1x8x128xf32>,
    return
  }
  func.func @transform_0(%arg0: i32) -> (i32, i32) {
    %c0_i32 = arith.constant 0 : i32
    %c0_i32_0 = arith.constant 0 : i32
    return %arg0, %c0_i32 : i32, i32
  }
  func.func @transform_1(%arg0: i32) -> (i32, i32) {
    %c0_i32 = arith.constant 0 : i32
    %c0_i32_0 = arith.constant 0 : i32
    return %arg0, %c0_i32 : i32, i32
  }
  func.func @transform_2(%arg0: i32) -> (i32, i32) {
    %c0_i32 = arith.constant 0 : i32
    %c0_i32_0 = arith.constant 0 : i32
    return %arg0, %c0_i32 : i32, i32
  }
  func.func @transform_3(%arg0: i32) -> (i32, i32) {
    %c0_i32 = arith.constant 0 : i32
    %c0_i32_0 = arith.constant 0 : i32
    return %arg0, %c0_i32 : i32, i32
  }
  func.func @transform_4(%arg0: i32) -> (i32, i32) {
    %c0_i32 = arith.constant 0 : i32
    %c0_i32_0 = arith.constant 0 : i32
    return %arg0, %c0_i32 : i32, i32
  }
  func.func @transform_5(%arg0: i32) -> (i32, i32) {
    %c0_i32 = arith.constant 0 : i32
    %c0_i32_0 = arith.constant 0 : i32
    return %arg0, %c0_i32 : i32, i32
  }
  func.func @transform_6(%arg0: i32) -> (i32, i32, i32, i32) {
    %c0_i32 = arith.constant 0 : i32
    %c0_i32_0 = arith.constant 0 : i32
    %c0_i32_1 = arith.constant 0 : i32
    %c0_i32_2 = arith.constant 0 : i32
    return %arg0, %c0_i32, %c0_i32_0, %c0_i32_1 : i32, i32, i32, i32
  }
}

</mosaic_0001>

<bundles_post_ra>
// kernel: tpu_custom_call.1
= control target key start
LH: loop header
LB: loop body
LE: loop exit
PB: predicated region body
PF: predicated region fallthrough
CT: control target
= control target key end

     0   :  { %11 = vsyncpa [#allocation3], 0  ;;  %s4340_s0 = inlined_call_operand.vmem [shape: bf16[300,128], index: 0, kind: input, shape index: {}]   ;;  %s4341_s1 = inlined_call_operand.vmem [shape: s32[300,1], index: 1, kind: input, shape index: {}]   ;;  %s4342_s2 = inlined_call_operand.vmem [shape: bf16[300,128], index: 2, kind: input, shape index: {}]   ;;  %s4343_s3 = inlined_call_operand.vmem [shape: s32[300,1], index: 3, kind: input, shape index: {}]   ;;  %s4344_s4 = inlined_call_operand.hbm [shape: bf16[300,128], index: 4, kind: input, shape index: {}]   ;;  %s4345_s5 = inlined_call_operand.vmem [shape: f32[300,128], index: 5, kind: input, shape index: {}]   ;;  %s4346_s6 = inlined_call_operand.hbm [shape: f32[2,3,8,128], index: 6, kind: output, shape index: {}]  }
   0x1   :  { %13 = vsyncpa [#allocation3 + $0x1], 0 }
   0x2   :  { %14 = vsyncpa [#allocation4], 0 }
   0x3   :  { %16 = vsyncpa [#allocation4 + $0x1], 0  ;;  %s2638_s21 = smov 0   ;;  %s2640_s22 = smov 0  }
   0x4   :  { %s2642_s23 = smov 0   ;;  %s2644_s24 = smov 0  }
   0x5 LB: > { %s2659_s25 = sadd.s32 4294967295, %s2593_s24   ;;  %s2025_s26 = sadd.s32 4294967294, %s2593_s24   ;;  %s2593_s24 = sphi %s2644_s24, %s4540_s24   ;;  %s2589_s23 = sphi %s2642_s23, %s4539_s23   ;;  %s2585_s22 = sphi %s2640_s22, %s4538_s22   ;;  %s2581_s21 = sphi %s2638_s21, %s4537_s21  }
   0x6   : > { %s2663_s27 = sadd.s32 1, %s2593_s24   ;;  %s133_s28 = sadd.s32 1, %s2589_s23 }
   0x7   : > { %s130_s29 = ssub.s32 %s2593_s24, %s2663_s27  ;;  %p140_p0 = scmp.ne.s32.totalorder %s2589_s23, %s2585_s22 }
   0x8   : > { %p131_p1 = scmp.eq.s32.totalorder %s130_s29, 0  ;;  %p141_p2 = scmp.eq.s32.totalorder %s2593_s24, 0 }
   0x9   : > { %p146_p3 = scmp.ne.s32.totalorder %s2585_s22, %s2581_s21  ;;  %p147_p4 = scmp.eq.s32.totalorder %s2659_s25, 0 }
   0xa   : > { %s2675_s30 = scalar_select %p131_p1, %s2589_s23, %s133_s28  }
   0xb   : > { %p142_p5 = por %p141_p2, %p140_p0  ;;  %p2677_p6 = por %p147_p4, %p146_p3 }
   0xc   : > { %p196_p7 = scmp.eq.s32.totalorder %s2659_s25, 1  ;;  %p202_p8 = scmp.eq.s32.totalorder %s2025_s26, 1 }
   0xd   : > { %p2189_p10 = scmp.lt.s32.totalorder %s2593_s24, 2  ;;  %s258_s10 = sand.u32 1, %s2589_s23  }
   0xe   : > { %p2684_p11 = por %p196_p7, %p140_p0  ;;  %p2688_p12 = por %p202_p8, %p146_p3 }
   0xf   : > { %s2040_s11 = smul.u32 1216, %s2593_s24  ;;  %p2699_p13 = pnand %p2189_p10, %p142_p5 }
  0x10   : > { %s4397_s8 = scalar_select %p2684_p11, 1, 0 }
  0x11   : > { %s4398_s9 = scalar_select %p2688_p12, 1, 0 }
  0x12   : > { %s2173_s12 = smul.u32 76, %s258_s10  ;;  %s2697_s15 = scalar_lea.hbm %s4344_s4, %s2040_s11 }
  0x13   : > { %s2705_s19 = scalar_lea.sflag [#allocation3], %s258_s10  ;;  %s2497_s20 = scalar_lea.hbm %s2697_s15, 1216 }
  0x14   : > { %s262_s17 = scalar_lea.vmem [#allocation2], %s2173_s12  ;;  %p2498_p0 = scmp.ne.s32.totalorder %s2697_s15, %s2497_s20 }
  0x15   : > { %s269_s18 = sshll.u32 %s262_s17, 4  ;;  %p2499_p1 = pneg %p2699_p13  ;;  %s2703_s18 = int_to_ptr.vmem [resolvable:$true] %s269_s18 }
  0x16   : > { %s2502_s29 = scalar_lea.hbm %s4344_s4, 2432  ;;  %p2503_p4 = scmp.lt.u32.totalorder %s2697_s15, %s4344_s4 }
  0x17   : > { %p2500_p2 = pnand %p2499_p1, %p2498_p0  ;;  %p2504_p5 = scmp.lt.u32.totalorder %s2502_s29, %s2497_s20 }
  0x18   : > { %p2506_p8 = scmp.lt.u32.totalorder %s2497_s20, %s2697_s15 }
  0x19   : > { %p2501_p3 = pneg %p2500_p2  ;;  %p2505_p7 = por %p2504_p5, %p2503_p4 }
  0x1b   : > { %p2507_p10 = por %p2506_p8, %p2505_p7 }
  0x1d   : > { %p2508_p9 = pnand %p2507_p10, %p2501_p3 }
  0x1f   : > { %2511 = shalt.err (!%p2508_p9)
}
  0x20   : > { %s2512_s10 = scalar_lea.vmem %s2703_s18, 1216  ;;  %s2595_s12 = smov [#allocation2]  }
  0x21   : > { %p2513_p0 = scmp.ne.s32.totalorder %s2703_s18, %s2512_s10  ;;  %s2517_s14 = sshll.u32 %s2595_s12, 4  ;;  %s2518_s14 = int_to_ptr.vmem [resolvable:$false] %s2517_s14 }
  0x22   : > { %s2519_s17 = scalar_lea.vmem %s2518_s14, 2432  ;;  %p2520_p11 = scmp.lt.s32.totalorder %s2703_s18, %s2518_s14 }
  0x23   : > { %p2515_p2 = pnand %p2513_p0, %p2499_p1  ;;  %p2521_p4 = scmp.lt.s32.totalorder %s2519_s17, %s2512_s10 }
  0x25   : > { %p2516_p12 = pneg %p2515_p2  ;;  %p2522_p5 = por %p2521_p4, %p2520_p11 }
  0x27   : > { %p2523_p7 = pnand %p2522_p5, %p2516_p12 }
  0x29   : > { %2526 = shalt.err (!%p2523_p7)
}
  0x2a   : > { %s2596_s20 = smov 64   ;;  %s2597_s26 = smov 4  }
  0x2b   : > { %2184 = dma.hbm_to_vmem [thread:$0]  (!%p2699_p13), %s2697_s15, 1216, %s2703_s18, %s2705_s19, %s2596_s20, %s2596_s20, %s2597_s26  }
  0x2c   : > { %p2029_p9 = scmp.ge.s32.totalorder %s2593_s24, 1  ;;  %p286_p1 = scmp.lt.s32.totalorder %s2593_s24, 3 }
  0x2e   : > { %p287_p3 = pnand %p2029_p9, %p286_p1 }
  0x30   : > { %290 = sbr.rel (%p287_p3) target bundleno = 805 (0x325), region = 44 }
  0x37   : > { %s2736_s28 = sand.u32 1, %s2585_s22  }
  0x38   : > { %s2174_s29 = smul.u32 76, %s2736_s28  ;;  %s293_s11 = scalar_lea.sflag [#allocation3], %s2736_s28 }
  0x3a   : > { %s2740_s13 = scalar_lea.vmem [#allocation2], %s2174_s29 }
  0x3b   : > { %2572 = dma.done.wait (%p2677_p6), %s293_s11, 1216  }
  0x3c   : > { %2574 = vsyncadd (%p2677_p6), %s293_s11, 4294966080  ;;  %s350_s15 = smul.u32 19, %s2659_s25  ;;  %v2598_v0 = vmov 0   ;;  %v381_v16 = vlaneseq  ;;  %p4534_p12 = scmp.ne.s32.totalorder %s4397_s8, 0 }
  0x3d   : > { %2230 = vset.pattern.permute.xlu1 %v2598_v0  ;;  %2229 = vset.pattern.permute.xlu0 %v2598_v0  ;;  %s383_s7 = smul.u32 152, %s2659_s25 }
  0x3e   : > { %p351_p11 = scmp.lt.s32.totalorder %s350_s15, 37  ;;  %v2776_v17 = vshrl.u32 %v381_v16, 7 }
  0x3f   : > { %v2785_v18 = vstv %s383_s7 }
  0x40   : > { %s4542_s15 = smov (!%p351_p11, %s350_s15), 37  ;;  %v2789_v19 = vadd.s32 %v2785_v18, %v2776_v17  ;;  %v388_v21 = vadd.s32 24, %v2776_v17  ;;  %v386_v23 = vadd.s32 8, %v2776_v17  ;;  %v390_v26 = vadd.s32 40, %v2776_v17 }
  0x41   : > { %s2750_s16 = sshll.u32 %s4542_s15, 3  ;;  %s2030_s12 = sshll.u32 %s4542_s15, 2  ;;  %v387_v29 = vadd.s32 16, %v2776_v17  ;;  %v392_v33 = vadd.s32 56, %v2776_v17  ;;  %v389_v35 = vadd.s32 32, %v2776_v17  ;;  %v394_v41 = vadd.s32 72, %v2776_v17 }
  0x42   : > { %s2756_s10 = scalar_lea.vmem %s4341_s1, %s2750_s16  ;;  %s2783_s20 = scalar_lea.vmem %s4340_s0, %s2030_s12  ;;  %4400 = vst [vmem:[#allocation8_spill] sm:$0xff] %v2789_v19  ;;  %vm424_vm0 = vcmp.lt.s32.totalorder %v2789_v19, 300  ;;  %v2797_v25 = vadd.s32 %v2785_v18, %v388_v21  ;;  %v2805_v28 = vadd.s32 %v2785_v18, %v386_v23  ;;  %v2811_v32 = vadd.s32 %v2785_v18, %v390_v26 }
  0x43   : > { %v540_v1 = vld [vmem:[%s2756_s10 + $0x10] sm:$0xff]  ;;  %v538_v2 = vld [vmem:[%s2756_s10] sm:$0xff]  ;;  %v541_v3 = vld [vmem:[%s2756_s10 + $0x18] sm:$0xff]  ;;  %v2818_v36 = vadd.s32 %v2785_v18, %v387_v29  ;;  %v2827_v40 = vadd.s32 %v2785_v18, %v392_v33  ;;  %v391_v44 = vadd.s32 48, %v2776_v17  ;;  %v2838_v45 = vadd.s32 %v2785_v18, %v389_v35  ;;  %s3115_s11 = scalar_lea.vmem %s4343_s3, %s2750_s16  ;;  %s3254_s7 = scalar_lea.vmem %s4345_s5, %s2750_s16 }
  0x44   : > { %564 = vperm.xlu1 %2230, %v540_v1   ;;  %558 = vperm.xlu0 %2229, %v538_v2   ;;  %v539_v4 = vld [vmem:[%s2756_s10 + $0x8] sm:$0xff]  ;;  %v542_v6 = vld [vmem:[%s2756_s10 + $0x20] sm:$0xff]  ;;  %v545_v7 = vld [vmem:[%s2756_s10 + $0x38] sm:$0xff]  ;;  %4401 = vst [vmem:[#allocation9_spill] sm:$0xff] %v2797_v25  ;;  %vm427_vm1 = vcmp.lt.s32.totalorder %v2797_v25, 300  ;;  %vm425_vm2 = vcmp.lt.s32.totalorder %v2805_v28, 300  ;;  %v2847_v49 = vadd.s32 %v2785_v18, %v394_v41  ;;  %s3335_s17 = scalar_lea.vmem %s4342_s2, %s2030_s12 }
  0x45   : > { %v543_v5 = vld [vmem:[%s2756_s10 + $0x28] sm:$0xff]  ;;  %v544_v8 = vld [vmem:[%s2756_s10 + $0x30] sm:$0xff]  ;;  %v546_v10 = vld [vmem:[%s2756_s10 + $0x40] sm:$0xff]  ;;  %4402 = vst [vmem:[#allocation10_spill] sm:$0xff] %v2805_v28  ;;  %vm429_vm3 = vcmp.lt.s32.totalorder %v2811_v32, 300  ;;  %vm426_vm4 = vcmp.lt.s32.totalorder %v2818_v36, 300  ;;  %v2857_v53 = vadd.s32 %v2785_v18, %v391_v44 }
  0x46   : > { %v547_v9 = vld [vmem:[%s2756_s10 + $0x48] sm:$0xff]  ;;  %v549_v11 = vld [vmem:[%s2756_s10 + $0x58] sm:$0xff]  ;;  %v548_v12 = vld [vmem:[%s2756_s10 + $0x50] sm:$0xff]  ;;  %4403 = vst [vmem:[#allocation11_spill] sm:$0xff] %v2811_v32  ;;  %vm431_vm5 = vcmp.lt.s32.totalorder %v2827_v40, 300  ;;  %v396_v50 = vadd.s32 88, %v2776_v17 }
  0x47   : > { %v550_v13 = vld [vmem:[%s2756_s10 + $0x60] sm:$0xff]  ;;  %v552_v14 = vld [vmem:[%s2756_s10 + $0x70] sm:$0xff]  ;;  %v2149_v24 = vld [vmem:[%s2783_s20 + $0x8] sm:$0xff]   ;;  %4404 = vst [vmem:[#allocation12_spill] sm:$0xff] %v2818_v36  ;;  %vm428_vm6 = vcmp.lt.s32.totalorder %v2838_v45, 300  ;;  %v393_v55 = vadd.s32 64, %v2776_v17 }
  0x48   : > { %567 = vperm.xlu1 %2230, %v541_v3   ;;  %561 = vperm.xlu0 %2229, %v539_v4   ;;  %v554_v15 = vld [vmem:[%s2756_s10 + $0x80] sm:$0xff]  ;;  %v2048_v30 = vunpack.c.h.bf16 %v2149_v24  ;;  %v2150_v31 = vld [vmem:[%s2783_s20 + $0x10] sm:$0xff]   ;;  %v2151_v39 = vld [vmem:[%s2783_s20 + $0x18] sm:$0xff]   ;;  %4405 = vst [vmem:[#allocation13_spill] sm:$0xff] %v2827_v40  ;;  %v2047_v43 = vunpack.c.l.bf16 %v2149_v24  ;;  %vm433_vm7 = vcmp.lt.s32.totalorder %v2847_v49, 300  ;;  %v2868_v58 = vadd.s32 %v2785_v18, %v396_v50  ;;  %s2176_s12 = smul.u32 384, %s2659_s25 }
  0x49   : > { %v2042_v20 = vld [vmem:[%s2783_s20] sm:$0xff]   ;;  %v2052_v38 = vunpack.c.h.bf16 %v2150_v31  ;;  %4406 = vst [vmem:[#allocation14_spill] sm:$0xff] %v2838_v45  ;;  %v2056_v47 = vunpack.c.h.bf16 %v2151_v39  ;;  %4407 = vst [vmem:[#allocation15_spill] sm:$0xff] %v2847_v49  ;;  %v2051_v52 = vunpack.c.l.bf16 %v2150_v31  ;;  %v2153_v57 = vld [vmem:[%s2783_s20 + $0x28] sm:$0xff]   ;;  %v398_v59 = vadd.s32 104, %v2776_v17  ;;  %s2600_s25 = smov [#allocation5]  }
  0x4a   : > { %v2043_v22 = vunpack.c.l.bf16 %v2042_v20  ;;  %v2044_v34 = vunpack.c.h.bf16 %v2042_v20  ;;  %v2822_v37 = vsel %vm427_vm1, %v2048_v30, 0.0  ;;  %v2152_v48 = vld [vmem:[%s2783_s20 + $0x20] sm:$0xff]   ;;  %v2853_v51 = vsel %vm426_vm4, %v2047_v43, 0.0  ;;  %4408 = vst [vmem:[#allocation16_spill] sm:$0xff] %v2857_v53  ;;  %4409 = vst [vmem:[#allocation17_spill] sm:$0xff] %v2868_v58  ;;  %v2154_v2 = vld [vmem:[%s2783_s20 + $0x30] sm:$0xff]   ;;  %s4295_s29 = scalar_lea.hbm %s4346_s6, %s2176_s12 }
  0x4b   : > { %v2842_v46 = vsel %vm429_vm3, %v2052_v38, 0.0  ;;  %v2862_v54 = vsel %vm431_vm5, %v2056_v47, 0.0  ;;  %v2060_v56 = vunpack.c.h.bf16 %v2152_v48  ;;  %v2874_v60 = vsel %vm428_vm6, %v2051_v52, 0.0  ;;  %v2156_v24 = vld [vmem:[%s2783_s20 + $0x40] sm:$0xff]   ;;  %v461_v52 = vld [vmem:[%s2783_s20 + $0x48] sm:$0xf] }
  0x4c   : > { %573 = vperm.xlu1 %2230, %v543_v5   ;;  %570 = vperm.xlu0 %2229, %v542_v6   ;;  %v2802_v27 = vsel %vm424_vm0, %v2043_v22, 0.0  ;;  %v2832_v42 = vsel %vm425_vm2, %v2044_v34, 0.0  ;;  %vm430_vm8 = vcmp.lt.s32.totalorder %v2857_v53, 300  ;;  %v2055_v61 = vunpack.c.l.bf16 %v2151_v39  ;;  %v3422_v25 = vld [vmem:[%s3335_s17 + $0x18] sm:$0xff]   ;;  %s2531_s19 = sshll.u32 %s2600_s25, 4  ;;  %s2532_s19 = int_to_ptr.vmem [resolvable:$false] %s2531_s19 }
  0x4d   : > { %v2879_v62 = vadd.s32 %v2785_v18, %v393_v55  ;;  %v2883_v63 = vsel %vm433_vm7, %v2060_v56, 0.0  ;;  %v395_v0 = vadd.s32 80, %v2776_v17  ;;  %v2064_v1 = vunpack.c.h.bf16 %v2153_v57 }
  0x4e   : > { %vm4355_vm9 = vcmp.lt.s32.totalorder %v2868_v58, 300  ;;  %v2889_v3 = vadd.s32 %v2785_v18, %v398_v59  ;;  %v400_v4 = vadd.s32 120, %v2776_v17  ;;  %v2895_v5 = vsel %vm430_vm8, %v2055_v61, 0.0 }
  0x4f   : > { %4410 = vst [vmem:[#allocation18_spill] sm:$0xff] %v2879_v62  ;;  %v2059_v6 = vunpack.c.l.bf16 %v2152_v48  ;;  %vm432_vm10 = vcmp.lt.s32.totalorder %v2879_v62, 300  ;;  %v399_v22 = vadd.s32 112, %v2776_v17  ;;  %v2067_v30 = vunpack.c.l.bf16 %v2154_v2 }
  0x50   : > { %579 = vperm.xlu1 %2230, %v545_v7   ;;  %576 = vperm.xlu0 %2229, %v544_v8   ;;  %v397_v7 = vadd.s32 96, %v2776_v17  ;;  %v2901_v8 = vadd.s32 %v2785_v18, %v395_v0  ;;  %vm4348_vm11 = vcmp.lt.s32.totalorder %v2889_v3, 300  ;;  %v401_v34 = vadd.s32 128, %v2776_v17 }
  0x51   : > { %v2941_v31 = vadd.s32 %v2785_v18, %v399_v22  ;;  %v2076_v35 = vunpack.c.h.bf16 %v2156_v24  ;;  %v403_v44 = vadd.s32 144, %v2776_v17  ;;  %v2075_v48 = vunpack.c.l.bf16 %v2156_v24 }
  0x52   : > { %v2920_v20 = vadd.s32 %v2785_v18, %v397_v7  ;;  %vm4382_vm12 = vcmp.lt.s32.totalorder %v2901_v8, 300  ;;  %v2957_v41 = vadd.s32 %v2785_v18, %v401_v34  ;;  %v480_v55 = vunpack.c.l.bf16 %v461_v52 }
  0x53   : > { %v2972_v50 = vadd.s32 %v2785_v18, %v403_v44 }
  0x54   : > { %585 = vperm.xlu1 %2230, %v547_v9   ;;  %582 = vperm.xlu0 %2229, %v546_v10   ;;  %v2905_v9 = vsel %vm4355_vm9, %v2064_v1, 0.0  ;;  %v2068_v10 = vunpack.c.h.bf16 %v2154_v2  ;;  %4411 = vst [vmem:[#allocation19_spill] sm:$0xff] %v2920_v20  ;;  %vm4354_vm14 = vcmp.lt.s32.totalorder %v2920_v20, 300 }
  0x55   : > { %v2952_v38 = vsel %vm4354_vm14, %v2067_v30, 0.0  ;;  %4413 = vst [vmem:[#allocation21_spill] sm:$0xff] %v2972_v50 }
  0x56   : > { %v2925_v21 = vsel %vm4348_vm11, %v2068_v10, 0.0  ;;  %vm4351_vm11 = vcmp.lt.s32.totalorder %v2941_v31, 300 }
  0x58   : > { %591 = vperm.xlu1 %2230, %v549_v11   ;;  %588 = vperm.xlu0 %2229, %v548_v12   ;;  %v2155_v11 = vld [vmem:[%s2783_s20 + $0x38] sm:$0xff]   ;;  %v2910_v12 = vadd.s32 %v2785_v18, %v400_v4 }
  0x59   : > { %v2072_v23 = vunpack.c.h.bf16 %v2155_v11  ;;  %v2071_v39 = vunpack.c.l.bf16 %v2155_v11 }
  0x5a   : > { %vm4349_vm13 = vcmp.lt.s32.totalorder %v2910_v12, 300 }
  0x5b   : > { %v2945_v33 = vsel %vm4349_vm13, %v2072_v23, 0.0  ;;  %v2967_v47 = vsel %vm4351_vm11, %v2071_v39, 0.0  ;;  %vm4352_vm13 = vcmp.lt.s32.totalorder %v2957_v41, 300 }
  0x5c   : > { %594 = vperm.xlu0 %2229, %v550_v13   ;;  %v402_v13 = vadd.s32 136, %v2776_v17  ;;  %v2978_v17 = vsel %vm4352_vm13, %v2075_v48, 0.0 }
  0x5e   : > { %v2931_v26 = vadd.s32 %v2785_v18, %v402_v13  ;;  %v2988_v18 = vand.u32 127, %v381_v16 }
  0x60   : > { %600 = vperm.xlu0 %2229, %v552_v14   ;;  %v2916_v14 = vsel %vm432_vm10, %v2059_v6, 0.0  ;;  %4412 = vst [vmem:[#allocation20_spill] sm:$0xff] %v2931_v26  ;;  %vm4350_vm15 = vcmp.lt.s32.totalorder %v2931_v26, 300 }
  0x61   : > { %v2961_v43 = vsel %vm4350_vm15, %v2076_v35, 0.0  ;;  %vm4353_vm15 = vcmp.lt.s32.totalorder %v2972_v50, 300 }
  0x62   : > { %v2984_v56 = vsel %vm4353_vm15, %v480_v55, 0.0 }
  0x63   : > { %4414 = vst [vmem:[#allocation22_spill] sm:$0xff] %v2984_v56 }
  0x64   : > { %606 = vperm.xlu0 %2229, %v554_v15   ;;  %v2063_v15 = vunpack.c.l.bf16 %v2153_v57 }
  0x66   : > { %v2936_v29 = vsel %vm4382_vm12, %v2063_v15, 0.0 }
  0x7c   : > { %633 = vmax.xlane.f32.xlu1 %v2802_v27 }
  0x80   : > { %639 = vmax.xlane.f32.xlu1 %v2822_v37 }
  0x83   : > { %635 = vmax.xlane.f32.xlu0 %v2832_v42 }
  0x84   : > { %643 = vmax.xlane.f32.xlu1 %v2842_v46 }
  0x87   : > { %637 = vmax.xlane.f32.xlu0 %v2853_v51 }
  0x88   : > { %647 = vmax.xlane.f32.xlu1 %v2862_v54 }
  0x8b   : > { %641 = vmax.xlane.f32.xlu0 %v2874_v60 }
  0x8c   : > { %651 = vmax.xlane.f32.xlu1 %v2883_v63 }
  0x8f   : > { %645 = vmax.xlane.f32.xlu0 %v2895_v5 }
  0x90   : > { %655 = vmax.xlane.f32.xlu1 %v2905_v9 }
  0x93   : > { %649 = vmax.xlane.f32.xlu0 %v2916_v14 }
  0x94   : > { %659 = vmax.xlane.f32.xlu1 %v2925_v21 }
  0x97   : > { %653 = vmax.xlane.f32.xlu0 %v2936_v29 }
  0x98   : > { %663 = vmax.xlane.f32.xlu1 %v2945_v33 }
  0x9b   : > { %657 = vmax.xlane.f32.xlu0 %v2952_v38 }
  0x9c   : > { %667 = vmax.xlane.f32.xlu1 %v2961_v43 }
  0x9f   : > { %661 = vmax.xlane.f32.xlu0 %v2967_v47 }
  0xa3   : > { %665 = vmax.xlane.f32.xlu0 %v2978_v17 }
  0xa7   : > { %669 = vmax.xlane.f32.xlu0 %v2984_v56 }
  0xc3   : > { %v565_v57 = vpop.permute.xlu1 %564  ;;  %v559_v59 = vpop.permute.xlu0 %558 }
  0xc4   : > { %vm616_vm11 = vcmp.eq.s32.totalorder %v2988_v18, %v565_v57  ;;  %vm614_vm13 = vcmp.eq.s32.totalorder %v2988_v18, %v559_v59 }
  0xc5   : > { %v823_v61 = vsel %vm614_vm13, %v2802_v27, 0.0  ;;  %v825_v2 = vsel %vm616_vm11, %v2853_v51, 0.0 }
  0xc6   : > { %842 = vadd.xlane.f32.xlu0 %v823_v61 }
  0xc7   : > { %v568_v0 = vpop.permute.xlu1 %567  ;;  %v562_v1 = vpop.permute.xlu0 %561 }
  0xc8   : > { %vm617_vm15 = vcmp.eq.s32.totalorder %v2988_v18, %v568_v0  ;;  %vm615_vm14 = vcmp.eq.s32.totalorder %v2988_v18, %v562_v1 }
  0xc9   : > { %v824_v16 = vsel %vm615_vm14, %v2832_v42, 0.0  ;;  %v826_v7 = vsel %vm617_vm15, %v2822_v37, 0.0 }
  0xca   : > { %844 = vadd.xlane.f32.xlu1 %v824_v16  ;;  %846 = vadd.xlane.f32.xlu0 %v825_v2 }
  0xcb   : > { %v574_v4 = vpop.permute.xlu1 %573  ;;  %v571_v6 = vpop.permute.xlu0 %570 }
  0xcc   : > { %vm618_vm9 = vcmp.eq.s32.totalorder %v2988_v18, %v571_v6  ;;  %vm619_vm13 = vcmp.eq.s32.totalorder %v2988_v18, %v574_v4 }
  0xcd   : > { %v827_v10 = vsel %vm618_vm9, %v2874_v60, 0.0  ;;  %v828_v15 = vsel %vm619_vm13, %v2842_v46, 0.0 }
  0xce   : > { %848 = vadd.xlane.f32.xlu1 %v826_v7  ;;  %850 = vadd.xlane.f32.xlu0 %v827_v10 }
  0xcf   : > { %v580_v11 = vpop.permute.xlu1 %579  ;;  %v577_v13 = vpop.permute.xlu0 %576 }
  0xd0   : > { %vm620_vm11 = vcmp.eq.s32.totalorder %v2988_v18, %v577_v13  ;;  %vm621_vm14 = vcmp.eq.s32.totalorder %v2988_v18, %v580_v11 }
  0xd1   : > { %v829_v22 = vsel %vm620_vm11, %v2895_v5, 0.0  ;;  %v830_v24 = vsel %vm621_vm14, %v2862_v54, 0.0 }
  0xd2   : > { %852 = vadd.xlane.f32.xlu1 %v828_v15  ;;  %854 = vadd.xlane.f32.xlu0 %v829_v22 }
  0xd3   : > { %v583_v23 = vpop.permute.xlu0 %582  ;;  %v3010_v35 = vpop.permute.xlu1 %585 }
  0xd4   : > { %vm622_vm15 = vcmp.eq.s32.totalorder %v2988_v18, %v583_v23  ;;  %vm623_vm13 = vcmp.eq.s32.totalorder %v2988_v18, %v3010_v35  ;;  %v553_v35 = vld [vmem:[%s2756_s10 + $0x78] sm:$0xff] }
  0xd5   : > { %v831_v30 = vsel %vm622_vm15, %v2916_v14, 0.0  ;;  %vm4422_vm15 = vcmp.lt.s32.totalorder %v2868_v58, 300 }
  0xd6   : > { %856 = vadd.xlane.f32.xlu1 %v830_v24  ;;  %858 = vadd.xlane.f32.xlu0 %v831_v30 }
  0xd7   : > { %v3008_v34 = vpop.permute.xlu0 %588  ;;  %v3014_v44 = vpop.permute.xlu1 %591 }
  0xd8   : > { %vm624_vm9 = vcmp.eq.s32.totalorder %v2988_v18, %v3008_v34  ;;  %vm625_vm11 = vcmp.eq.s32.totalorder %v2988_v18, %v3014_v44  ;;  %v1005_v44 = vld [vmem:[%s3115_s11 + $0x38] sm:$0xff] }
  0xd9   : > { %v834_v34 = vsel %vm625_vm11, %v2905_v9, 0.0 }
  0xdb   : > { %v3012_v39 = vpop.permute.xlu0 %594 }
  0xdc   : > { %vm626_vm14 = vcmp.eq.s32.totalorder %v2988_v18, %v3012_v39  ;;  %v1003_v39 = vld [vmem:[%s3115_s11 + $0x28] sm:$0xff] }
  0xdf   : > { %v3016_v48 = vpop.permute.xlu0 %600 }
  0xe0   : > { %vm628_vm11 = vcmp.eq.s32.totalorder %v2988_v18, %v3016_v48 }
  0xe3   : > { %v3022_v57 = vpop.permute.xlu0 %606 }
 0x109   : > { %v3018_v52 = vpop.xlane.xlu1 %633 }
 0x10a   : > { %v671_v55 = vsub.f32 %v2802_v27, %v3018_v52 }
 0x10c   : > { %v690_v59 = vmul.f32 1.442695, %v671_v55 }
 0x10d   : > { %v3024_v61 = vpop.xlane.xlu1 %639 }
 0x10e   : > { %2231 = vpow2.f32 %v690_v59  ;;  %v674_v0 = vsub.f32 %v2822_v37, %v3024_v61 }
 0x110   : > { %v3028_v1 = vpop.xlane.xlu0 %635  ;;  %v696_v6 = vmul.f32 1.442695, %v674_v0 }
 0x111   : > { %v672_v2 = vsub.f32 %v2832_v42, %v3028_v1  ;;  %v3032_v16 = vpop.xlane.xlu1 %643 }
 0x112   : > { %v676_v27 = vsub.f32 %v2842_v46, %v3032_v16 }
 0x113   : > { %v692_v4 = vmul.f32 1.442695, %v672_v2 }
 0x114   : > { %v3036_v7 = vpop.xlane.xlu0 %637  ;;  %v700_v13 = vmul.f32 1.442695, %v676_v27 }
 0x115   : > { %2233 = vpow2.f32 %v692_v4  ;;  %v673_v10 = vsub.f32 %v2853_v51, %v3036_v7  ;;  %v3040_v11 = vpop.xlane.xlu1 %647 }
 0x116   : > { %2235 = vpow2.f32 %v696_v6  ;;  %v678_v42 = vsub.f32 %v2862_v54, %v3040_v11 }
 0x117   : > { %v694_v37 = vmul.f32 1.442695, %v673_v10 }
 0x118   : > { %v2232_v15 = vpop.eup %2231  ;;  %v3044_v22 = vpop.xlane.xlu0 %641  ;;  %v704_v51 = vmul.f32 1.442695, %v678_v42 }
 0x119   : > { %2237 = vpow2.f32 %v694_v37  ;;  %v675_v46 = vsub.f32 %v2874_v60, %v3044_v22  ;;  %728 = vadd.xlane.f32.xlu1 %v2232_v15  ;;  %v3048_v23 = vpop.xlane.xlu1 %651 }
 0x11a   : > { %2239 = vpow2.f32 %v700_v13  ;;  %v680_v30 = vsub.f32 %v2883_v63, %v3048_v23 }
 0x11b   : > { %v698_v24 = vmul.f32 1.442695, %v675_v46 }
 0x11c   : > { %v3052_v55 = vpop.xlane.xlu0 %645  ;;  %v708_v60 = vmul.f32 1.442695, %v680_v30 }
 0x11d   : > { %2241 = vpow2.f32 %v698_v24  ;;  %v677_v54 = vsub.f32 %v2895_v5, %v3052_v55  ;;  %v3056_v59 = vpop.xlane.xlu1 %655 }
 0x11e   : > { %2243 = vpow2.f32 %v704_v51  ;;  %v682_v4 = vsub.f32 %v2905_v9, %v3056_v59  ;;  %v1000_v9 = vld [vmem:[%s3115_s11 + $0x10] sm:$0xff] }
 0x11f   : > { %v2234_v0 = vpop.eup %2233  ;;  %v702_v2 = vmul.f32 1.442695, %v677_v54 }
 0x120   : > { %v3060_v6 = vpop.xlane.xlu0 %649  ;;  %730 = vadd.xlane.f32.xlu0 %v2234_v0  ;;  %v2236_v27 = vpop.eup %2235  ;;  %v712_v42 = vmul.f32 1.442695, %v682_v4 }
 0x121   : > { %2245 = vpow2.f32 %v702_v2  ;;  %v679_v10 = vsub.f32 %v2916_v14, %v3060_v6  ;;  %v3064_v37 = vpop.xlane.xlu1 %659 }
 0x122   : > { %4415 = vst [vmem:[#allocation23_spill] sm:$0xff] %v3064_v37  ;;  %2247 = vpow2.f32 %v708_v60  ;;  %v684_v15 = vsub.f32 %v2925_v21, %v3064_v37 }
 0x123   : > { %v2238_v5 = vpop.eup %2237  ;;  %v706_v13 = vmul.f32 1.442695, %v679_v10 }
 0x124   : > { %v3068_v46 = vpop.xlane.xlu0 %653  ;;  %732 = vadd.xlane.f32.xlu1 %v2238_v5  ;;  %734 = vadd.xlane.f32.xlu0 %v2236_v27  ;;  %v2240_v24 = vpop.eup %2239  ;;  %v716_v0 = vmul.f32 1.442695, %v684_v15 }
 0x125   : > { %2249 = vpow2.f32 %v706_v13  ;;  %v681_v51 = vsub.f32 %v2936_v29, %v3068_v46  ;;  %v3072_v30 = vpop.xlane.xlu1 %663 }
 0x126   : > { %4416 = vst [vmem:[#allocation24_spill] sm:$0xff] %v3072_v30  ;;  %2251 = vpow2.f32 %v712_v42  ;;  %v686_v2 = vsub.f32 %v2945_v33, %v3072_v30 }
 0x127   : > { %v2242_v14 = vpop.eup %2241  ;;  %v710_v54 = vmul.f32 1.442695, %v681_v51 }
 0x128   : > { %v3076_v60 = vpop.xlane.xlu0 %657  ;;  %736 = vadd.xlane.f32.xlu1 %v2242_v14  ;;  %738 = vadd.xlane.f32.xlu0 %v2240_v24  ;;  %v2244_v4 = vpop.eup %2243  ;;  %v720_v51 = vmul.f32 1.442695, %v686_v2 }
 0x129   : > { %2253 = vpow2.f32 %v710_v54  ;;  %v683_v27 = vsub.f32 %v2952_v38, %v3076_v60  ;;  %v3080_v10 = vpop.xlane.xlu1 %667 }
 0x12a   : > { %4417 = vst [vmem:[#allocation25_spill] sm:$0xff] %v3080_v10  ;;  %2255 = vpow2.f32 %v716_v0  ;;  %v688_v42 = vsub.f32 %v2961_v43, %v3080_v10 }
 0x12b   : > { %v2246_v5 = vpop.eup %2245  ;;  %v714_v13 = vmul.f32 1.442695, %v683_v27 }
 0x12c   : > { %v3084_v15 = vpop.xlane.xlu0 %661  ;;  %740 = vadd.xlane.f32.xlu1 %v2246_v5  ;;  %742 = vadd.xlane.f32.xlu0 %v2244_v4  ;;  %v2248_v14 = vpop.eup %2247  ;;  %v724_v37 = vmul.f32 1.442695, %v688_v42 }
 0x12d   : > { %4418 = vst [vmem:[#allocation26_spill] sm:$0xff] %v3084_v15  ;;  %2257 = vpow2.f32 %v714_v13  ;;  %v685_v24 = vsub.f32 %v2967_v47, %v3084_v15 }
 0x12e   : > { %2259 = vpow2.f32 %v720_v51 }
 0x12f   : > { %v2250_v54 = vpop.eup %2249  ;;  %v718_v30 = vmul.f32 1.442695, %v685_v24 }
 0x130   : > { %v3088_v50 = vpop.xlane.xlu0 %665  ;;  %744 = vadd.xlane.f32.xlu1 %v2250_v54  ;;  %746 = vadd.xlane.f32.xlu0 %v2248_v14  ;;  %v2252_v0 = vpop.eup %2251 }
 0x131   : > { %4419 = vst [vmem:[#allocation27_spill] sm:$0xff] %v3088_v50  ;;  %2261 = vpow2.f32 %v718_v30  ;;  %v687_v2 = vsub.f32 %v2978_v17, %v3088_v50 }
 0x132   : > { %2263 = vpow2.f32 %v724_v37 }
 0x133   : > { %v2254_v27 = vpop.eup %2253  ;;  %v722_v4 = vmul.f32 1.442695, %v687_v2  ;;  %v833_v2 = vsel %vm624_vm9, %v2936_v29, 0.0  ;;  %v835_v29 = vsel %vm626_vm14, %v2952_v38, 0.0  ;;  %v1001_v38 = vld [vmem:[%s3115_s11 + $0x18] sm:$0xff]  ;;  %vm4423_vm9 = vcmp.lt.s32.totalorder %v2920_v20, 300 }
 0x134   : > { %v3092_v5 = vpop.xlane.xlu0 %669  ;;  %748 = vadd.xlane.f32.xlu1 %v2254_v27  ;;  %750 = vadd.xlane.f32.xlu0 %v2252_v0  ;;  %v2256_v13 = vpop.eup %2255  ;;  %v832_v27 = vsel %vm623_vm13, %v2883_v63, 0.0  ;;  %v998_v63 = vld [vmem:[%s3115_s11] sm:$0xff] }
 0x135   : > { %4420 = vst [vmem:[#allocation28_spill] sm:$0xff] %v3092_v5  ;;  %2265 = vpow2.f32 %v722_v4  ;;  %v689_v51 = vsub.f32 %v2984_v56, %v3092_v5  ;;  %v551_v4 = vld [vmem:[%s2756_s10 + $0x68] sm:$0xff] }
 0x136   : > { %v2114_v56 = vld [vmem:[%s2740_s13] sm:$0xff]  }
 0x137   : > { %v2258_v42 = vpop.eup %2257  ;;  %v726_v24 = vmul.f32 1.442695, %v689_v51  ;;  %v1008_v51 = vld [vmem:[%s3115_s11 + $0x50] sm:$0xff] }
 0x138   : > { %752 = vadd.xlane.f32.xlu1 %v2258_v42  ;;  %754 = vadd.xlane.f32.xlu0 %v2256_v13  ;;  %v2260_v30 = vpop.eup %2259  ;;  %v555_v13 = vld [vmem:[%s2756_s10 + $0x88] sm:$0xff] }
 0x139   : > { %2267 = vpow2.f32 %v726_v24  ;;  %v1011_v42 = vld [vmem:[%s3115_s11 + $0x68] sm:$0xff] }
 0x13b   : > { %v2262_v14 = vpop.eup %2261 }
 0x13c   : > { %756 = vadd.xlane.f32.xlu1 %v2262_v14  ;;  %758 = vadd.xlane.f32.xlu0 %v2260_v30  ;;  %v2264_v54 = vpop.eup %2263 }
 0x13f   : > { %v2266_v37 = vpop.eup %2265 }
 0x140   : > { %760 = vadd.xlane.f32.xlu1 %v2266_v37  ;;  %762 = vadd.xlane.f32.xlu0 %v2264_v54 }
 0x143   : > { %v2268_v0 = vpop.eup %2267 }
 0x144   : > { %764 = vadd.xlane.f32.xlu1 %v2268_v0  ;;  %862 = vadd.xlane.f32.xlu0 %v833_v2 }
 0x148   : > { %860 = vadd.xlane.f32.xlu1 %v832_v27  ;;  %864 = vadd.xlane.f32.xlu0 %v834_v34 }
 0x14c   : > { %866 = vadd.xlane.f32.xlu1 %v835_v29 }
 0x153   : > { %v843_v30 = vpop.xlane.xlu0 %842 }
 0x157   : > { %v845_v24 = vpop.xlane.xlu1 %844  ;;  %v847_v54 = vpop.xlane.xlu0 %846 }
 0x15b   : > { %v3124_v14 = vpop.xlane.xlu1 %848  ;;  %v3128_v0 = vpop.xlane.xlu0 %850 }
 0x15d   : > { %597 = vperm.xlu1 %2230, %v551_v4  }
 0x15f   : > { %v3126_v37 = vpop.xlane.xlu1 %852  ;;  %v3132_v27 = vpop.xlane.xlu0 %854 }
 0x161   : > { %603 = vperm.xlu1 %2230, %v553_v35  }
 0x163   : > { %v3130_v2 = vpop.xlane.xlu1 %856  ;;  %v3134_v29 = vpop.xlane.xlu0 %858 }
 0x165   : > { %609 = vperm.xlu1 %2230, %v555_v13  }
 0x169   : > { %1018 = vperm.xlu1 %2230, %v998_v63  }
 0x16d   : > { %1024 = vperm.xlu1 %2230, %v1000_v9  }
 0x171   : > { %1027 = vperm.xlu1 %2230, %v1001_v38  }
 0x175   : > { %1033 = vperm.xlu1 %2230, %v1003_v39  }
 0x179   : > { %1039 = vperm.xlu1 %2230, %v1005_v44  }
 0x17d   : > { %1048 = vperm.xlu1 %2230, %v1008_v51  }
 0x181   : > { %1057 = vperm.xlu1 %2230, %v1011_v42  }
 0x1a6   : > { %v729_v34 = vpop.xlane.xlu1 %728 }
 0x1a7   : > { %2269 = vlog2.f32 %v729_v34 }
 0x1ad   : > { %v731_v4 = vpop.xlane.xlu0 %730 }
 0x1ae   : > { %2271 = vlog2.f32 %v731_v4 }
 0x1b1   : > { %v2270_v35 = vpop.eup %2269  ;;  %v733_v13 = vpop.xlane.xlu1 %732 }
 0x1b2   : > { %v735_v63 = vpop.xlane.xlu0 %734  ;;  %2273 = vlog2.f32 %v733_v13  ;;  %v767_v9 = vmul.f32 0.6931472, %v2270_v35 }
 0x1b3   : > { %2275 = vlog2.f32 %v735_v63  ;;  %v2115_v63 = vunpack.c.l.bf16 %v2114_v56 }
 0x1b4   : > { %v804_v44 = vadd.f32 %v767_v9, %v3018_v52 }
 0x1b5   : > { %v737_v38 = vpop.xlane.xlu1 %736 }
 0x1b6   : > { %v739_v39 = vpop.xlane.xlu0 %738  ;;  %2277 = vlog2.f32 %v737_v38  ;;  %v880_v4 = vsub.f32 %v804_v44, %v843_v30  ;;  %v2116_v44 = vunpack.c.h.bf16 %v2114_v56 }
 0x1b7   : > { %2279 = vlog2.f32 %v739_v39 }
 0x1b8   : > { %v2272_v51 = vpop.eup %2271  ;;  %v899_v9 = vsel %vm424_vm0, %v880_v4, 0.0 }
 0x1b9   : > { %v769_v42 = vmul.f32 0.6931472, %v2272_v51  ;;  %v741_v34 = vpop.xlane.xlu1 %740 }
 0x1ba   : > { %v743_v5 = vpop.xlane.xlu0 %742  ;;  %2281 = vlog2.f32 %v741_v34 }
 0x1bb   : > { %v805_v10 = vadd.f32 %v769_v42, %v3028_v1  ;;  %2283 = vlog2.f32 %v743_v5  ;;  %v2165_v5 = vld [vmem:[%s2740_s13 + $0x8] sm:$0xff]  }
 0x1bc   : > { %v2274_v13 = vpop.eup %2273 }
 0x1bd   : > { %v2276_v35 = vpop.eup %2275  ;;  %v881_v50 = vsub.f32 %v805_v10, %v845_v24  ;;  %v771_v15 = vmul.f32 0.6931472, %v2274_v13  ;;  %v745_v38 = vpop.xlane.xlu1 %744  ;;  %v3148_v24 = vsel %vm424_vm0, %v2115_v63, 0.0 }
 0x1be   : > { %v747_v26 = vpop.xlane.xlu0 %746  ;;  %v773_v52 = vmul.f32 0.6931472, %v2276_v35  ;;  %2285 = vlog2.f32 %v745_v38 }
 0x1bf   : > { %v900_v39 = vsel %vm425_vm2, %v881_v50, 0.0  ;;  %v806_v30 = vadd.f32 %v771_v15, %v3036_v7  ;;  %v2119_v7 = vunpack.c.l.bf16 %v2165_v5 }
 0x1c0   : > { %v2278_v1 = vpop.eup %2277  ;;  %v918_v51 = vadd.f32 %v900_v39, %v899_v9  ;;  %v807_v42 = vadd.f32 %v773_v52, %v3024_v61  ;;  %v1628_v52 = vand.u32 2147483647, %v3148_v24 }
 0x1c1   : > { %v2280_v10 = vpop.eup %2279  ;;  %v882_v34 = vsub.f32 %v806_v30, %v847_v54  ;;  %v775_v13 = vmul.f32 0.6931472, %v2278_v1  ;;  %v749_v35 = vpop.xlane.xlu1 %748  ;;  %v3157_v54 = vsel %vm425_vm2, %v2116_v44, 0.0 }
 0x1c2   : > { %v751_v4 = vpop.xlane.xlu0 %750  ;;  %v883_v38 = vsub.f32 %v807_v42, %v3124_v14  ;;  %v777_v50 = vmul.f32 0.6931472, %v2280_v10  ;;  %2287 = vlog2.f32 %v749_v35  ;;  %v2120_v42 = vunpack.c.h.bf16 %v2165_v5 }
 0x1c3   : > { %v901_v56 = vsel %vm426_vm4, %v882_v34, 0.0  ;;  %v808_v15 = vadd.f32 %v775_v13, %v3044_v22  ;;  %2289 = vlog2.f32 %v747_v26  ;;  %v1647_v35 = vsub.f32 0.0, %v1628_v52 }
 0x1c4   : > { %v2282_v61 = vpop.eup %2281  ;;  %v919_v63 = vadd.f32 %v918_v51, %v901_v56  ;;  %v809_v9 = vadd.f32 %v777_v50, %v3032_v16  ;;  %v902_v39 = vsel %vm427_vm1, %v883_v38, 0.0  ;;  %2291 = vlog2.f32 %v751_v4  ;;  %v2166_v50 = vld [vmem:[%s2740_s13 + $0x10] sm:$0xff]  }
 0x1c5   : > { %v2284_v14 = vpop.eup %2283  ;;  %v884_v30 = vsub.f32 %v808_v15, %v3128_v0  ;;  %v779_v1 = vmul.f32 0.6931472, %v2282_v61  ;;  %v753_v26 = vpop.xlane.xlu1 %752  ;;  %v1629_v51 = vand.u32 2147483647, %v3157_v54  ;;  %v3172_v4 = vsel %vm426_vm4, %v2119_v7, 0.0 }
 0x1c6   : > { %v3163_v22 = vpop.xlane.xlu0 %754  ;;  %v920_v10 = vadd.f32 %v919_v63, %v902_v39  ;;  %v885_v44 = vsub.f32 %v809_v9, %v3126_v37  ;;  %v781_v34 = vmul.f32 0.6931472, %v2284_v14  ;;  %2293 = vlog2.f32 %v753_v26 }
 0x1c7   : > { %v903_v16 = vsel %vm428_vm6, %v884_v30, 0.0  ;;  %v810_v13 = vadd.f32 %v779_v1, %v3052_v55  ;;  %v3185_v52 = vsel %vm427_vm1, %v2120_v42, 0.0  ;;  %v1648_v9 = vsub.f32 0.0, %v1629_v51 }
 0x1c8   : > { %v2286_v0 = vpop.eup %2285  ;;  %v921_v38 = vadd.f32 %v920_v10, %v903_v16  ;;  %v811_v5 = vadd.f32 %v781_v34, %v3040_v11  ;;  %v904_v37 = vsel %vm429_vm3, %v885_v44, 0.0  ;;  %v1630_v11 = vand.u32 2147483647, %v3172_v4 }
 0x1c9   : > { %v886_v56 = vsub.f32 %v810_v13, %v3132_v27  ;;  %v783_v15 = vmul.f32 0.6931472, %v2286_v0  ;;  %v3179_v61 = vpop.xlane.xlu1 %756  ;;  %v1666_v30 = vmul.f32 1.442695, %v1647_v35  ;;  %v2123_v1 = vunpack.c.l.bf16 %v2166_v50 }
 0x1ca   : > { %v3181_v55 = vpop.xlane.xlu0 %758  ;;  %v922_v7 = vadd.f32 %v921_v38, %v904_v37  ;;  %v887_v63 = vsub.f32 %v811_v5, %v3130_v2  ;;  %v1631_v44 = vand.u32 2147483647, %v3185_v52  ;;  %v2124_v13 = vunpack.c.h.bf16 %v2166_v50 }
 0x1cb   : > { %v905_v14 = vsel %vm430_vm8, %v886_v56, 0.0  ;;  %v812_v27 = vadd.f32 %v783_v15, %v3060_v6  ;;  %v1668_v35 = vmul.f32 1.442695, %v1648_v9  ;;  %v1649_v38 = vsub.f32 0.0, %v1630_v11 }
 0x1cc   : > { %v2288_v39 = vpop.eup %2287  ;;  %v923_v26 = vadd.f32 %v922_v7, %v905_v14  ;;  %v906_v51 = vsel %vm431_vm5, %v887_v63, 0.0  ;;  %2295 = vpow2.f32 %v1666_v30  ;;  %v1650_v14 = vsub.f32 0.0, %v1631_v44  ;;  %v2167_v63 = vld [vmem:[%s2740_s13 + $0x18] sm:$0xff]  }
 0x1cd   : > { %v2290_v10 = vpop.eup %2289  ;;  %v888_v42 = vsub.f32 %v812_v27, %v3134_v29  ;;  %v787_v34 = vmul.f32 0.6931472, %v2288_v39  ;;  %v3194_v16 = vpop.xlane.xlu1 %760  ;;  %v3205_v29 = vsel %vm428_vm6, %v2123_v1, 0.0  ;;  %2297 = vpow2.f32 %v1668_v35 }
 0x1ce   : > { %v3196_v2 = vpop.xlane.xlu0 %762  ;;  %v924_v6 = vadd.f32 %v923_v26, %v906_v51  ;;  %v2292_v0 = vpop.eup %2291  ;;  %v785_v56 = vmul.f32 0.6931472, %v2290_v10  ;;  %v1632_v39 = vand.u32 2147483647, %v3205_v29  ;;  %v3213_v30 = vsel %vm429_vm3, %v2124_v13, 0.0 }
 0x1cf   : > { %v814_v5 = vadd.f32 %v787_v34, %v3068_v46  ;;  %v907_v37 = vsel %vm432_vm10, %v888_v42, 0.0  ;;  %v789_v9 = vmul.f32 0.6931472, %v2292_v0  ;;  %v1670_v46 = vmul.f32 1.442695, %v1649_v38 }
 0x1d0   : > { %v925_v15 = vadd.f32 %v924_v6, %v907_v37  ;;  %v2294_v7 = vpop.eup %2293  ;;  %v2127_v1 = vunpack.c.l.bf16 %v2167_v63  ;;  %v813_v10 = vadd.f32 %v785_v56, %v3048_v23  ;;  %v1672_v44 = vmul.f32 1.442695, %v1650_v14  ;;  %v2168_v56 = vld [vmem:[%s2740_s13 + $0x20] sm:$0xff]  }
 0x1d1   : > { %v3208_v50 = vpop.xlane.xlu1 %764  ;;  %v791_v26 = vmul.f32 0.6931472, %v2294_v7  ;;  %v1633_v51 = vand.u32 2147483647, %v3213_v30  ;;  %v815_v0 = vadd.f32 %v789_v9, %v3056_v59  ;;  %2299 = vpow2.f32 %v1670_v46 }
 0x1d2   : > { %4421 = vst [vmem:[#allocation29_spill] sm:$0xff] %v3208_v50  ;;  %v863_v27 = vpop.xlane.xlu0 %862  ;;  %v1651_v35 = vsub.f32 0.0, %v1632_v39  ;;  %v2128_v38 = vunpack.c.h.bf16 %v2167_v63  ;;  %v3220_v13 = vsel %vm430_vm8, %v2127_v1, 0.0  ;;  %2301 = vpow2.f32 %v1672_v44  ;;  %v1014_v50 = vld [vmem:[%s3115_s11 + $0x80] sm:$0xff] }
 0x1d3   : > { %v890_v11 = vsub.f32 %v814_v5, %v863_v27  ;;  %v816_v23 = vadd.f32 %v791_v26, %v3076_v60  ;;  %v1634_v46 = vand.u32 2147483647, %v3220_v13 }
 0x1d4   : > { %v1674_v9 = vmul.f32 1.442695, %v1651_v35  ;;  %v3231_v39 = vsel %vm431_vm5, %v2128_v38, 0.0 }
 0x1d5   : > { %v861_v42 = vpop.xlane.xlu1 %860  ;;  %v909_v59 = vsel %vm4382_vm12, %v890_v11, 0.0  ;;  %v1635_v11 = vand.u32 2147483647, %v3231_v39 }
 0x1d6   : > { %v865_v34 = vpop.xlane.xlu0 %864  ;;  %v889_v6 = vsub.f32 %v813_v10, %v861_v42  ;;  %v2296_v27 = vpop.eup %2295  ;;  %v1652_v10 = vsub.f32 0.0, %v1633_v51  ;;  %v2131_v42 = vunpack.c.l.bf16 %v2168_v56  ;;  %2303 = vpow2.f32 %v1674_v9 }
 0x1d7   : > { %v891_v37 = vsub.f32 %v815_v0, %v865_v34  ;;  %v1704_v26 = vadd.f32 1.0, %v2296_v27  ;;  %v1653_v0 = vsub.f32 0.0, %v1634_v46  ;;  %v1654_v27 = vsub.f32 0.0, %v1635_v11 }
 0x1d8   : > { %v908_v5 = vsel %vm433_vm7, %v889_v6, 0.0  ;;  %v1676_v51 = vmul.f32 1.442695, %v1652_v10  ;;  %v2169_v10 = vld [vmem:[%s2740_s13 + $0x28] sm:$0xff]  }
 0x1d9   : > { %v926_v7 = vadd.f32 %v925_v15, %v908_v5  ;;  %v867_v14 = vpop.xlane.xlu1 %866  ;;  %v910_v60 = vsel %vm4422_vm15, %v891_v37, 0.0  ;;  %v2298_v15 = vpop.eup %2297  ;;  %v3244_v37 = vsel %vm432_vm10, %v2131_v42, 0.0  ;;  %2305 = vlog2.f32 %v1704_v26  ;;  %v1590_v42 = vld [vmem:[%s3254_s7] sm:$0xff] }
 0x1da   : > { %v892_v63 = vsub.f32 %v816_v23, %v867_v14  ;;  %v1705_v5 = vadd.f32 1.0, %v2298_v15  ;;  %2307 = vpow2.f32 %v1676_v51  ;;  %v1636_v48 = vand.u32 2147483647, %v3244_v37  ;;  %v1593_v51 = vld [vmem:[%s3254_s7 + $0x18] sm:$0xff] }
 0x1db   : > { %v927_v1 = vadd.f32 %v926_v7, %v909_v59  ;;  %v2300_v23 = vpop.eup %2299  ;;  %v2132_v7 = vunpack.c.h.bf16 %v2168_v56  ;;  %vm630_vm15 = vcmp.eq.s32.totalorder %v2988_v18, %v3022_v57  ;;  %v1680_v15 = vmul.f32 1.442695, %v1654_v27 }
 0x1dc   : > { %v911_v6 = vsel %vm4423_vm9, %v892_v63, 0.0  ;;  %v2302_v59 = vpop.eup %2301  ;;  %v837_v63 = vsel %vm628_vm11, %v2967_v47, 0.0  ;;  %2309 = vlog2.f32 %v1705_v5  ;;  %v1706_v9 = vadd.f32 1.0, %v2300_v23  ;;  %v1592_v47 = vld [vmem:[%s3254_s7 + $0x10] sm:$0xff] }
 0x1dd   : > { %v928_v44 = vadd.f32 %v927_v1, %v910_v60  ;;  %v598_v34 = vpop.permute.xlu1 %597  ;;  %v3263_v46 = vsel %vm433_vm7, %v2132_v7, 0.0  ;;  %v1707_v60 = vadd.f32 1.0, %v2302_v59  ;;  %v2135_v26 = vunpack.c.l.bf16 %v2169_v10 }
 0x1de   : > { %vm627_vm13 = vcmp.eq.s32.totalorder %v2988_v18, %v598_v34  ;;  %v839_v34 = vsel %vm630_vm15, %v2978_v17, 0.0  ;;  %v1637_v11 = vand.u32 2147483647, %v3263_v46  ;;  %v1611_v5 = vsel %vm426_vm4, %v1592_v47, 0.0 }
 0x1df   : > { %v3239_v35 = vadd.f32 %v928_v44, %v911_v6  ;;  %v836_v38 = vsel %vm627_vm13, %v2925_v21, 0.0  ;;  %v1678_v21 = vmul.f32 1.442695, %v1653_v0  ;;  %v1655_v44 = vsub.f32 0.0, %v1636_v48 }
 0x1e0   : > { %868 = vadd.xlane.f32.xlu0 %v836_v38  ;;  %v2304_v6 = vpop.eup %2303  ;;  %v1609_v0 = vsel %vm424_vm0, %v1590_v42, 0.0  ;;  %v1612_v23 = vsel %vm427_vm1, %v1593_v51, 0.0  ;;  %v1761_v59 = vmax.f32 %v3148_v24, 0.0  ;;  %vm4425_vm13 = vcmp.lt.s32.totalorder %v2868_v58, 300 }
 0x1e1   : > { %4424 = vst [vmem:[#allocation30_spill] sm:$0xff] %v3239_v35  ;;  %v604_v14 = vpop.permute.xlu1 %603  ;;  %2311 = vpow2.f32 %v1678_v21  ;;  %v1682_v7 = vmul.f32 1.442695, %v1655_v44  ;;  %v1780_v21 = vmul.f32 %v1609_v0, %v3148_v24  ;;  %v1708_v48 = vadd.f32 1.0, %v2304_v6  ;;  %v1595_v0 = vld [vmem:[%s3254_s7 + $0x28] sm:$0xff] }
 0x1e2   : > { %vm629_vm14 = vcmp.eq.s32.totalorder %v2988_v18, %v604_v14  ;;  %2313 = vlog2.f32 %v1706_v9  ;;  %v2136_v14 = vunpack.c.h.bf16 %v2169_v10  ;;  %v1762_v9 = vmax.f32 %v3157_v54, 0.0 }
 0x1e3   : > { %v838_v56 = vsel %vm629_vm14, %v2945_v33, 0.0  ;;  %v1591_v33 = vld [vmem:[%s3254_s7 + $0x8] sm:$0xff]  ;;  %2315 = vpow2.f32 %v1680_v15  ;;  %v2306_v17 = vpop.eup %2305  ;;  %v1782_v10 = vmul.f32 %v1611_v5, %v3172_v4  ;;  %v1783_v24 = vmul.f32 %v1612_v23, %v3185_v52 }
 0x1e4   : > { %872 = vadd.xlane.f32.xlu1 %v838_v56  ;;  %870 = vadd.xlane.f32.xlu0 %v837_v63  ;;  %v1610_v38 = vsel %vm425_vm2, %v1591_v33, 0.0  ;;  %2317 = vlog2.f32 %v1707_v60  ;;  %v2308_v27 = vpop.eup %2307  ;;  %v1656_v56 = vsub.f32 0.0, %v1637_v11  ;;  %v2170_v63 = vld [vmem:[%s2740_s13 + $0x30] sm:$0xff]   ;;  %v1763_v60 = vmax.f32 %v3172_v4, 0.0 }
 0x1e5   : > { %v610_v1 = vpop.permute.xlu1 %609  ;;  %v1709_v33 = vadd.f32 1.0, %v2308_v27  ;;  %2319 = vpow2.f32 %v1682_v7  ;;  %v3297_v47 = vsel %vm4425_vm13, %v2136_v14, 0.0  ;;  %v2139_v44 = vunpack.c.l.bf16 %v2170_v63 }
 0x1e6   : > { %vm631_vm9 = vcmp.eq.s32.totalorder %v2988_v18, %v610_v1  ;;  %v1781_v1 = vmul.f32 %v1610_v38, %v3157_v54  ;;  %v2310_v15 = vpop.eup %2309  ;;  %v1799_v54 = vsub.f32 %v1761_v59, %v1780_v21  ;;  %2321 = vlog2.f32 %v1708_v48  ;;  %v1596_v48 = vld [vmem:[%s3254_s7 + $0x30] sm:$0xff] }
 0x1e7   : > { %v840_v57 = vsel %vm631_vm9, %v2961_v43, 0.0  ;;  %v3281_v43 = vsel %vm4382_vm12, %v2135_v26, 0.0  ;;  %v1764_v26 = vmax.f32 %v3185_v52, 0.0  ;;  %v1724_v11 = vmul.f32 0.6931472, %v2306_v17 }
 0x1e8   : > { %876 = vadd.xlane.f32.xlu1 %v840_v57  ;;  %874 = vadd.xlane.f32.xlu0 %v839_v34  ;;  %v1638_v42 = vand.u32 2147483647, %v3281_v43  ;;  %v1594_v57 = vld [vmem:[%s3254_s7 + $0x20] sm:$0xff]  ;;  %v1684_v34 = vmul.f32 1.442695, %v1656_v56  ;;  %v1800_v4 = vsub.f32 %v1762_v9, %v1781_v1  ;;  %v1801_v5 = vsub.f32 %v1763_v60, %v1782_v10  ;;  %v1597_v9 = vld [vmem:[%s3254_s7 + $0x38] sm:$0xff] }
 0x1e9   : > { %v1726_v6 = vmul.f32 0.6931472, %v2310_v15  ;;  %v1802_v23 = vsub.f32 %v1764_v26, %v1783_v24  ;;  %v1639_v7 = vand.u32 2147483647, %v3297_v47  ;;  %v1613_v14 = vsel %vm428_vm6, %v1594_v57, 0.0  ;;  %v3314_v24 = vld [vmem:[%s2740_s13 + $0x38] sm:$0xff]  }
 0x1ea   : > { %v1657_v38 = vsub.f32 0.0, %v1638_v42  ;;  %v1765_v27 = vmax.f32 %v3205_v29, 0.0  ;;  %2323 = vlog2.f32 %v1709_v33  ;;  %vm4426_vm11 = vcmp.lt.s32.totalorder %v2920_v20, 300 }
 0x1eb   : > { %v2312_v51 = vpop.eup %2311  ;;  %v3307_v17 = vsel %vm4426_vm11, %v2139_v44, 0.0  ;;  %v1614_v21 = vsel %vm429_vm3, %v1595_v0, 0.0  ;;  %2325 = vpow2.f32 %v1684_v34  ;;  %v2140_v1 = vunpack.c.h.bf16 %v2170_v63 }
 0x1ec   : > { %v2314_v52 = vpop.eup %2313  ;;  %v1710_v56 = vadd.f32 1.0, %v2312_v51  ;;  %v1818_v15 = vadd.f32 %v1799_v54, %v1724_v11  ;;  %v1819_v60 = vadd.f32 %v1800_v4, %v1726_v6  ;;  %v1686_v26 = vmul.f32 1.442695, %v1657_v38 }
 0x1ed   : > { %v2316_v59 = vpop.eup %2315  ;;  %v1728_v10 = vmul.f32 0.6931472, %v2314_v52  ;;  %v1784_v33 = vmul.f32 %v1613_v14, %v3205_v29  ;;  %v1766_v44 = vmax.f32 %v3213_v30, 0.0  ;;  %v1658_v57 = vsub.f32 0.0, %v1639_v7 }
 0x1ee   : > { %v2318_v42 = vpop.eup %2317  ;;  %v1640_v0 = vand.u32 2147483647, %v3307_v17  ;;  %v1785_v51 = vmul.f32 %v1614_v21, %v3213_v30  ;;  %v1615_v63 = vsel %vm430_vm8, %v1596_v48, 0.0  ;;  %v1616_v54 = vsel %vm431_vm5, %v1597_v9, 0.0 }
 0x1ef   : > { %v1711_v34 = vadd.f32 1.0, %v2316_v59  ;;  %v1730_v11 = vmul.f32 0.6931472, %v2318_v42  ;;  %2327 = vlog2.f32 %v1710_v56  ;;  %vm4427_vm14 = vcmp.lt.s32.totalorder %v2889_v3, 300  ;;  %v2320_v4 = vpop.eup %2319  ;;  %v1016_v56 = vld [vmem:[%s3115_s11 + $0x90] sm:$0xff] }
 0x1f0   : > { %v3327_v29 = vsel %vm4427_vm14, %v2140_v1, 0.0  ;;  %v2143_v6 = vunpack.c.l.bf16 %v3314_v24  ;;  %v1837_v30 = vsel %vm424_vm0, %v1818_v15, 0.0  ;;  %v1838_v38 = vsel %vm425_vm2, %v1819_v60, 0.0  ;;  %v2322_v7 = vpop.eup %2321 }
 0x1f1   : > { %v1820_v52 = vadd.f32 %v1801_v5, %v1728_v10  ;;  %2329 = vpow2.f32 %v1686_v26  ;;  %v1767_v14 = vmax.f32 %v3220_v13, 0.0  ;;  %v1786_v59 = vmul.f32 %v1615_v63, %v3220_v13  ;;  %v556_v5 = vld [vmem:[%s2756_s10 + $0x90] sm:$0xff]  ;;  %v3354_v13 = vld [vmem:[%s3335_s17] sm:$0xff]  }
 0x1f2   : > { %v1688_v21 = vmul.f32 1.442695, %v1658_v57  ;;  %v1659_v48 = vsub.f32 0.0, %v1640_v0  ;;  %2331 = vlog2.f32 %v1711_v34  ;;  %v1768_v9 = vmax.f32 %v3231_v39, 0.0 }
 0x1f3   : > { %v1787_v1 = vmul.f32 %v1616_v54, %v3231_v39  ;;  %v1641_v42 = vand.u32 2147483647, %v3327_v29  ;;  %v1856_v15 = vadd.f32 %v1838_v38, %v1837_v30  ;;  %v1821_v60 = vadd.f32 %v1802_v23, %v1730_v11  ;;  %v1599_v30 = vld [vmem:[%s3254_s7 + $0x48] sm:$0xff] }
 0x1f4   : > { %v1712_v10 = vadd.f32 1.0, %v2320_v4  ;;  %vm4428_vm15 = vcmp.lt.s32.totalorder %v2941_v31, 300  ;;  %v2324_v57 = vpop.eup %2323  ;;  %v1839_v0 = vsel %vm426_vm4, %v1820_v52, 0.0  ;;  %v1732_v39 = vmul.f32 0.6931472, %v2322_v7 }
 0x1f5   : > { %v3351_v26 = vsel %vm4428_vm15, %v2143_v6, 0.0  ;;  %v1803_v63 = vsub.f32 %v1765_v27, %v1784_v33  ;;  %v2144_v54 = vunpack.c.h.bf16 %v3314_v24  ;;  %v2326_v23 = vpop.eup %2325  ;;  %v1804_v34 = vsub.f32 %v1766_v44, %v1785_v51  ;;  %v999_v33 = vld [vmem:[%s3115_s11 + $0x8] sm:$0xff] }
 0x1f6   : > { %v1805_v11 = vsub.f32 %v1767_v14, %v1786_v59  ;;  %2333 = vpow2.f32 %v1688_v21  ;;  %v1690_v4 = vmul.f32 1.442695, %v1659_v48  ;;  %v1660_v38 = vsub.f32 0.0, %v1641_v42  ;;  %v2157_v51 = vld [vmem:[%s3335_s17 + $0x8] sm:$0xff]  }
 0x1f7   : > { %v1642_v52 = vand.u32 2147483647, %v3351_v26  ;;  %v2079_v27 = vunpack.c.l.bf16 %v3354_v13  ;;  %v1857_v24 = vadd.f32 %v1856_v15, %v1839_v0  ;;  %v1840_v7 = vsel %vm427_vm1, %v1821_v60, 0.0  ;;  %v3384_v0 = vld [vmem:[%s3335_s17 + $0x10] sm:$0xff]  }
 0x1f8   : > { %v3367_v44 = vsub.f32 %v1768_v9, %v1787_v1  ;;  %2335 = vlog2.f32 %v1712_v10  ;;  %v1822_v14 = vadd.f32 %v1803_v63, %v1732_v39  ;;  %v1734_v59 = vmul.f32 0.6931472, %v2324_v57  ;;  %v1600_v1 = vld [vmem:[%s3254_s7 + $0x50] sm:$0xff]  ;;  %v1002_v39 = vld [vmem:[%s3115_s11 + $0x20] sm:$0xff] }
 0x1f9   : > { %1066 = vperm.xlu1 %2230, %v1014_v50   ;;  %v1598_v50 = vld [vmem:[%s3254_s7 + $0x40] sm:$0xff]  ;;  %v1713_v21 = vadd.f32 1.0, %v2326_v23  ;;  %vm4429_vm9 = vcmp.lt.s32.totalorder %v2910_v12, 300  ;;  %v1769_v42 = vmax.f32 %v3244_v37, 0.0  ;;  %v1618_v9 = vsel %vm433_vm7, %v1599_v30, 0.0 }
 0x1fa   : > { %v1617_v6 = vsel %vm432_vm10, %v1598_v50, 0.0  ;;  %v3372_v48 = vsel %vm4429_vm9, %v2144_v54, 0.0  ;;  %2337 = vpow2.f32 %v1690_v4  ;;  %v1692_v60 = vmul.f32 1.442695, %v1660_v38 }
 0x1fb   : > { %v1661_v50 = vsub.f32 0.0, %v1642_v52  ;;  %v3381_v10 = vsel %vm424_vm0, %v2079_v27, 0.0  ;;  %v2083_v57 = vunpack.c.l.bf16 %v2157_v51  ;;  %v1858_v63 = vadd.f32 %v1857_v24, %v1840_v7 }
 0x1fc   : > { %v1643_v54 = vand.u32 2147483647, %v3372_v48  ;;  %v2084_v23 = vunpack.c.h.bf16 %v2157_v51  ;;  %v1823_v30 = vadd.f32 %v1804_v34, %v1734_v59  ;;  %2339 = vlog2.f32 %v1713_v21  ;;  %v1004_v34 = vld [vmem:[%s3115_s11 + $0x30] sm:$0xff] }
 0x1fd   : > { %1072 = vperm.xlu1 %2230, %v1016_v56   ;;  %v2328_v56 = vpop.eup %2327  ;;  %v1619_v52 = vsel %vm4382_vm12, %v1600_v1, 0.0  ;;  %v2088_v24 = vunpack.c.h.bf16 %v3384_v0  ;;  %v1789_v7 = vmul.f32 %v1618_v9, %v3263_v46  ;;  %2341 = vpow2.f32 %v1692_v60 }
 0x1fe   : > { %612 = vperm.xlu0 %2229, %v556_v5   ;;  %v1788_v5 = vmul.f32 %v1617_v6, %v3244_v37  ;;  %v2330_v15 = vpop.eup %2329  ;;  %v1770_v37 = vmax.f32 %v3263_v46, 0.0  ;;  %v1841_v6 = vsel %vm428_vm6, %v1822_v14, 0.0  ;;  %v1736_v38 = vmul.f32 0.6931472, %v2328_v56 }
 0x1ff   : > { %v2332_v4 = vpop.eup %2331  ;;  %v1714_v27 = vadd.f32 1.0, %v2330_v15  ;;  %v1694_v51 = vmul.f32 1.442695, %v1661_v50  ;;  %v3398_v14 = vsel %vm426_vm4, %v2083_v57, 0.0  ;;  %v1859_v21 = vadd.f32 %v1858_v63, %v1841_v6  ;;  %v1601_v6 = vld [vmem:[%s3254_s7 + $0x58] sm:$0xff] }
 0x200   : > { %v2334_v59 = vpop.eup %2333  ;;  %v1738_v56 = vmul.f32 0.6931472, %v2332_v4  ;;  %v1662_v1 = vsub.f32 0.0, %v1643_v54  ;;  %v3403_v15 = vsel %vm427_vm1, %v2084_v23, 0.0  ;;  %v1842_v46 = vsel %vm429_vm3, %v1823_v30, 0.0 }
 0x201   : > { %v1824_v9 = vadd.f32 %v1805_v11, %v1736_v38  ;;  %v1771_v60 = vmax.f32 %v3281_v43, 0.0  ;;  %v1790_v50 = vmul.f32 %v1619_v52, %v3281_v43  ;;  %2343 = vlog2.f32 %v1714_v27  ;;  %v1006_v43 = vld [vmem:[%s3115_s11 + $0x40] sm:$0xff] }
 0x202   : > { %1021 = vperm.xlu0 %2229, %v999_v33   ;;  %v1093_v33 = vand.u32 2147483647, %v3381_v10  ;;  %v2336_v57 = vpop.eup %2335  ;;  %v1095_v54 = vand.u32 2147483647, %v3398_v14  ;;  %v3415_v23 = vsel %vm429_vm3, %v2088_v24, 0.0  ;;  %v1807_v4 = vsub.f32 %v1769_v42, %v1788_v5 }
 0x203   : > { %v1715_v11 = vadd.f32 1.0, %v2334_v59  ;;  %2345 = vpow2.f32 %v1694_v51  ;;  %v1096_v30 = vand.u32 2147483647, %v3403_v15  ;;  %v1860_v52 = vadd.f32 %v1859_v21, %v1842_v46 }
 0x204   : > { %v1112_v63 = vsub.f32 0.0, %v1093_v33  ;;  %v2338_v38 = vpop.eup %2337  ;;  %v1825_v27 = vadd.f32 %v3367_v44, %v1738_v56  ;;  %v1808_v33 = vsub.f32 %v1770_v37, %v1789_v7  ;;  %v1696_v35 = vmul.f32 1.442695, %v1662_v1  ;;  %v3433_v7 = vld [vmem:[%s3335_s17 + $0x28] sm:$0xff]  }
 0x205   : > { %v1843_v24 = vsel %vm430_vm8, %v1824_v9, 0.0  ;;  %v1740_v42 = vmul.f32 0.6931472, %v2336_v57  ;;  %v1098_v51 = vand.u32 2147483647, %v3415_v23  ;;  %v1620_v59 = vsel %vm4425_vm13, %v1601_v6, 0.0 }
 0x206   : > { %1030 = vperm.xlu0 %2229, %v1002_v39   ;;  %v3410_v39 = vld [vmem:[%s2740_s13 + $0x40] sm:$0xff]   ;;  %v1131_v44 = vmul.f32 1.442695, %v1112_v63  ;;  %v1114_v37 = vsub.f32 0.0, %v1095_v54  ;;  %4430 = vst [vmem:[#allocation31_spill] sm:$0xff] %v3433_v7  ;;  %v2340_v21 = vpop.eup %2339  ;;  %2347 = vlog2.f32 %v1715_v11  ;;  %v1772_v56 = vmax.f32 %v3297_v47, 0.0 }
 0x207   : > { %v2147_v5 = vunpack.c.l.bf16 %v3410_v39  ;;  %v1115_v1 = vsub.f32 0.0, %v1096_v30  ;;  %v2092_v46 = vunpack.c.h.bf16 %v3422_v25  ;;  %v1007_v9 = vld [vmem:[%s3115_s11 + $0x48] sm:$0xff]  ;;  %v1716_v57 = vadd.f32 1.0, %v2338_v38  ;;  %v2342_v54 = vpop.eup %2341 }
 0x208   : > { %2349 = vpow2.f32 %v1696_v35  ;;  %v1551_v63 = vld [vmem:[%s2740_s13 + $0x48] sm:$0xf]  ;;  %v1826_v6 = vadd.f32 %v1807_v4, %v1740_v42  ;;  %vm4431_vm11 = vcmp.lt.s32.totalorder %v2957_v41, 300  ;;  %v1117_v30 = vsub.f32 0.0, %v1098_v51  ;;  %s2175_s13 = smul.u32 24, %s2736_s28 }
 0x209   : > { %v3444_v11 = vsel %vm4431_vm11, %v2147_v5, 0.0  ;;  %v2099_v32 = vunpack.c.l.bf16 %v3433_v7  ;;  %v1742_v36 = vmul.f32 0.6931472, %v2340_v21  ;;  %2351 = vpow2.f32 %v1131_v44  ;;  %v3454_v42 = vld [vmem:[%s3335_s17 + $0x30] sm:$0xff]   ;;  %v1009_v5 = vld [vmem:[%s3115_s11 + $0x58] sm:$0xff] }
 0x20a   : > { %1036 = vperm.xlu0 %2229, %v1004_v34   ;;  %v3428_v34 = vsub.f32 %v1771_v60, %v1790_v50  ;;  %v1861_v60 = vadd.f32 %v1860_v52, %v1843_v24  ;;  %v1844_v50 = vsel %vm431_vm5, %v1825_v27, 0.0  ;;  %v2148_v52 = vunpack.c.h.bf16 %v3410_v39  ;;  %4432 = vst [vmem:[#allocation32_spill] sm:$0xff] %v3454_v42  ;;  %s3700_s15 = scalar_lea.vmem [#allocation5], %s2175_s13 }
 0x20b   : > { %v1135_v27 = vmul.f32 1.442695, %v1114_v37  ;;  %v1791_v35 = vmul.f32 %v1620_v59, %v3297_v47  ;;  %v1570_v38 = vunpack.c.l.bf16 %v1551_v63  ;;  %v1137_v24 = vmul.f32 1.442695, %v1115_v1  ;;  %v2344_v51 = vpop.eup %2343  ;;  %s1892_s10 = sshll.u32 %s3700_s15, 4  ;;  %s4290_s10 = int_to_ptr.vmem [resolvable:$true] %s1892_s10 }
 0x20c   : > { %v3451_v4 = vsel %vm431_vm5, %v2092_v46, 0.0  ;;  %vm4433_vm14 = vcmp.lt.s32.totalorder %v2920_v20, 300  ;;  %2353 = vlog2.f32 %v1716_v57  ;;  %v1717_v39 = vadd.f32 1.0, %v2342_v54  ;;  %s2527_s18 = scalar_lea.vmem %s4290_s10, 384  ;;  %p2534_p10 = scmp.lt.s32.totalorder %s4290_s10, %s2532_s19 }
 0x20d   : > { %v1644_v44 = vand.u32 2147483647, %v3444_v11  ;;  %v2346_v47 = vpop.eup %2345  ;;  %v1862_v59 = vadd.f32 %v1861_v60, %v1844_v50  ;;  %v1845_v37 = vsel %vm432_vm10, %v1826_v6, 0.0  ;;  %v1141_v1 = vmul.f32 1.442695, %v1117_v30  ;;  %v4436_v50 = vld [vmem:[#allocation21_spill] sm:$0xff]  ;;  %p2528_p6 = scmp.ne.s32.totalorder %s4290_s10, %s2527_s18 }
 0x20e   : > { %1042 = vperm.xlu0 %2229, %v1006_v43   ;;  %v1602_v43 = vld [vmem:[%s3254_s7 + $0x60] sm:$0xff]  ;;  %v3464_v46 = vsel %vm4382_vm12, %v2099_v32, 0.0  ;;  %2355 = vpow2.f32 %v1135_v27  ;;  %v1100_v57 = vand.u32 2147483647, %v3451_v4  ;;  %v2104_v54 = vunpack.c.h.bf16 %v3454_v42  ;;  %v1603_v32 = vld [vmem:[%s3254_s7 + $0x68] sm:$0xff] }
 0x20f   : > { %v1621_v21 = vsel %vm4433_vm14, %v1602_v43, 0.0  ;;  %v1827_v43 = vadd.f32 %v1808_v33, %v1742_v36  ;;  %v1744_v60 = vmul.f32 0.6931472, %v2344_v51  ;;  %vm4437_vm9 = vcmp.lt.s32.totalorder %v4436_v50, 300  ;;  %v1010_v30 = vld [vmem:[%s3115_s11 + $0x60] sm:$0xff]  ;;  %p2529_p13 = pnand %p2528_p6, %p4534_p12 }
 0x210   : > { %v3474_v6 = vsel %vm4437_vm9, %v1570_v38, 0.0  ;;  %2357 = vpow2.f32 %v1137_v24  ;;  %v1718_v40 = vadd.f32 1.0, %v2346_v47  ;;  %v1663_v7 = vsub.f32 0.0, %v1644_v44  ;;  %v2348_v27 = vpop.eup %2347  ;;  %v1012_v47 = vld [vmem:[%s3115_s11 + $0x70] sm:$0xff] }
 0x211   : > { %2359 = vlog2.f32 %v1717_v39  ;;  %v1810_v19 = vsub.f32 %v1772_v56, %v1791_v35  ;;  %v1773_v42 = vmax.f32 %v3307_v17, 0.0  ;;  %v1792_v38 = vmul.f32 %v1621_v21, %v3307_v17  ;;  %v1604_v21 = vld [vmem:[%s3254_s7 + $0x70] sm:$0xff]  ;;  %p2530_p8 = pneg %p2529_p13 }
 0x212   : > { %1045 = vperm.xlu0 %2229, %v1007_v9   ;;  %v4434_v9 = vld [vmem:[#allocation20_spill] sm:$0xff]  ;;  %2361 = vpow2.f32 %v1141_v1  ;;  %v2350_v33 = vpop.eup %2349  ;;  %v1646_v24 = vand.u32 2147483647, %v3474_v6  ;;  %vm4438_vm13 = vcmp.lt.s32.totalorder %v2889_v3, 300  ;;  %v1863_v39 = vadd.f32 %v1862_v59, %v1845_v37 }
 0x213   : > { %vm4435_vm15 = vcmp.lt.s32.totalorder %v4434_v9, 300  ;;  %v3485_v51 = vsel %vm4438_vm13, %v2104_v54, 0.0  ;;  %v1846_v56 = vsel %vm433_vm7, %v1827_v43, 0.0  ;;  %v1828_v35 = vadd.f32 %v3428_v34, %v1744_v60  ;;  %vm4440_vm11 = vmmov %vm4438_vm13  ;;  %v3493_v1 = vpop.eup %2351 }
 0x214   : > { %v3468_v63 = vsel %vm4435_vm15, %v2148_v52, 0.0  ;;  %v1103_v52 = vand.u32 2147483647, %v3464_v46  ;;  %4439 = vst [vmem:[#allocation20_spill] sm:$0xff] %v3485_v51  ;;  %v1622_v44 = vsel %vm4440_vm11, %v1603_v32, 0.0  ;;  %2363 = vlog2.f32 %v1718_v40 }
 0x215   : > { %v1645_v36 = vand.u32 2147483647, %v3468_v63  ;;  %v1746_v17 = vmul.f32 0.6931472, %v2348_v27  ;;  %v1719_v62 = vadd.f32 1.0, %v2350_v33  ;;  %v1774_v43 = vmax.f32 %v3327_v29, 0.0 }
 0x216   : > { %1051 = vperm.xlu0 %2229, %v1009_v5   ;;  %v1119_v5 = vsub.f32 0.0, %v1100_v57  ;;  %v1698_v57 = vmul.f32 1.442695, %v1663_v7  ;;  %v1122_v54 = vsub.f32 0.0, %v1103_v52  ;;  %v1106_v59 = vand.u32 2147483647, %v3485_v51  ;;  %v2354_v37 = vpop.eup %2353 }
 0x217   : > { %v1793_v34 = vmul.f32 %v1622_v44, %v3327_v29  ;;  %v1665_v60 = vsub.f32 0.0, %v1646_v24  ;;  %v1864_v49 = vadd.f32 %v1863_v39, %v1846_v56  ;;  %v1811_v53 = vsub.f32 %v1773_v42, %v1792_v38  ;;  %v1013_v52 = vld [vmem:[%s3115_s11 + $0x78] sm:$0xff] }
 0x218   : > { %v1145_v32 = vmul.f32 1.442695, %v1119_v5  ;;  %vm4441_vm14 = vcmp.lt.s32.totalorder %v2941_v31, 300  ;;  %v1169_v7 = vadd.f32 1.0, %v3493_v1  ;;  %v3503_v27 = vpop.eup %2355  ;;  %v1829_v33 = vadd.f32 %v1810_v19, %v1746_v17  ;;  %v1015_v17 = vld [vmem:[%s3115_s11 + $0x88] sm:$0xff]  ;;  %s1879_s11 = scalar_lea.sflag [#allocation4], %s2736_s28 }
 0x219   : > { %v1623_v40 = vsel %vm4441_vm14, %v1604_v21, 0.0  ;;  %2365 = vpow2.f32 %v1698_v57  ;;  %v1151_v51 = vmul.f32 1.442695, %v1122_v54  ;;  %v1748_v24 = vmul.f32 0.6931472, %v2354_v37 }
 0x21a   : > { %1054 = vperm.xlu0 %2229, %v1010_v30   ;;  %v1664_v30 = vsub.f32 0.0, %v1645_v36  ;;  %v1847_v36 = vsel %vm4382_vm12, %v1828_v35, 0.0  ;;  %v3507_v29 = vpop.eup %2357  ;;  %2367 = vlog2.f32 %v1719_v62  ;;  %v1125_v38 = vsub.f32 0.0, %v1106_v59  ;;  %v1605_v59 = vld [vmem:[%s3254_s7 + $0x78] sm:$0xff] }
 0x21b   : > { %v2360_v5 = vpop.eup %2359  ;;  %v1812_v39 = vsub.f32 %v1774_v43, %v1793_v34  ;;  %v1702_v56 = vmul.f32 1.442695, %v1665_v60  ;;  %2369 = vpow2.f32 %v1145_v32  ;;  %v1775_v35 = vmax.f32 %v3351_v26, 0.0  ;;  %v1606_v32 = vld [vmem:[%s3254_s7 + $0x80] sm:$0xff] }
 0x21c   : > { %v1700_v42 = vmul.f32 1.442695, %v1664_v30  ;;  %v3509_v44 = vpop.eup %2361  ;;  %v1794_v19 = vmul.f32 %v1623_v40, %v3351_v26  ;;  %2371 = vrcp.f32 %v1169_v7  ;;  %v1865_v21 = vadd.f32 %v1864_v49, %v1847_v36 }
 0x21d   : > { %vm4442_vm15 = vcmp.lt.s32.totalorder %v2868_v58, 300  ;;  %v1172_v57 = vadd.f32 1.0, %v3507_v29  ;;  %2373 = vpow2.f32 %v1151_v51  ;;  %v1830_v54 = vadd.f32 %v1811_v53, %v1748_v24 }
 0x21e   : > { %1060 = vperm.xlu0 %2229, %v1012_v47   ;;  %v1171_v47 = vadd.f32 1.0, %v3503_v27  ;;  %v1848_v62 = vsel %vm4442_vm15, %v1829_v33, 0.0  ;;  %v1750_v30 = vmul.f32 0.6931472, %v2360_v5  ;;  %2375 = vpow2.f32 %v1700_v42  ;;  %v2364_v43 = vpop.eup %2363 }
 0x21f   : > { %v1157_v37 = vmul.f32 1.442695, %v1125_v38  ;;  %2377 = vpow2.f32 %v1702_v56  ;;  %v1174_v26 = vadd.f32 1.0, %v3509_v44  ;;  %v1866_v34 = vadd.f32 %v1865_v21, %v1848_v62 }
 0x220   : > { %2379 = vrcp.f32 %v1171_v47  ;;  %v1813_v49 = vsub.f32 %v1775_v35, %v1794_v19  ;;  %vm4443_vm9 = vcmp.lt.s32.totalorder %v2910_v12, 300  ;;  %vm4444_vm13 = vcmp.lt.s32.totalorder %v2920_v20, 300  ;;  %v1607_v19 = vld [vmem:[%s3254_s7 + $0x88] sm:$0xff] }
 0x221   : > { %v1624_v60 = vsel %vm4443_vm9, %v1605_v59, 0.0  ;;  %2381 = vrcp.f32 %v1172_v57  ;;  %v1849_v53 = vsel %vm4444_vm13, %v1830_v54, 0.0  ;;  %v1831_v51 = vadd.f32 %v1812_v39, %v1750_v30 }
 0x222   : > { %1063 = vperm.xlu0 %2229, %v1013_v52   ;;  %v1752_v40 = vmul.f32 0.6931472, %v2364_v43  ;;  %2383 = vpow2.f32 %v1157_v37  ;;  %v1776_v33 = vmax.f32 %v3372_v48, 0.0  ;;  %v1795_v24 = vmul.f32 %v1624_v60, %v3372_v48  ;;  %v3541_v37 = vld [vmem:[%s3335_s17 + $0x40] sm:$0xff]  }
 0x223   : > { %v2366_v52 = vpop.eup %2365  ;;  %2385 = vrcp.f32 %v1174_v26  ;;  %vm4445_vm11 = vcmp.lt.s32.totalorder %v2957_v41, 300  ;;  %v1867_v5 = vadd.f32 %v1866_v34, %v1849_v53  ;;  %vm4446_vm14 = vcmp.lt.s32.totalorder %v2889_v3, 300 }
 0x224   : > { %v2368_v36 = vpop.eup %2367  ;;  %v1625_v42 = vsel %vm4445_vm11, %v1606_v32, 0.0  ;;  %v1850_v39 = vsel %vm4446_vm14, %v1831_v51, 0.0  ;;  %v1832_v35 = vadd.f32 %v1813_v49, %v1752_v40  ;;  %v1777_v62 = vmax.f32 %v3444_v11, 0.0  ;;  %v959_v51 = vld [vmem:[%s3335_s17 + $0x48] sm:$0xf] }
 0x225   : > { %v3529_v38 = vpop.eup %2369  ;;  %v1796_v48 = vmul.f32 %v1625_v42, %v3444_v11  ;;  %2387 = vlog2.f32 %v1169_v7  ;;  %v1814_v30 = vsub.f32 %v1776_v33, %v1795_v24  ;;  %v1868_v34 = vadd.f32 %v1867_v5, %v1850_v39 }
 0x226   : > { %1069 = vperm.xlu0 %2229, %v1015_v17   ;;  %v2372_v56 = vpop.eup %2371  ;;  %v1608_v17 = vld [vmem:[%s3254_s7 + $0x90] sm:$0xff]  ;;  %2389 = vlog2.f32 %v1171_v47  ;;  %v1176_v59 = vadd.f32 1.0, %v3529_v38  ;;  %v1754_v49 = vmul.f32 0.6931472, %v2368_v36  ;;  %vm4447_vm15 = vcmp.lt.s32.totalorder %v4434_v9, 300  ;;  %s2533_s7 = scalar_lea.vmem %s2532_s19, 768 }
 0x227   : > { %v3535_v21 = vpop.eup %2373  ;;  %v1626_v60 = vsel %vm4447_vm15, %v1607_v19, 0.0  ;;  %vm4448_vm9 = vcmp.lt.s32.totalorder %v4436_v50, 300  ;;  %vm4449_vm13 = vcmp.lt.s32.totalorder %v2941_v31, 300  ;;  %v1359_v7 = vmul.f32 %v2372_v56, %v3493_v1  ;;  %p2535_p0 = scmp.lt.s32.totalorder %s2533_s7, %s2527_s18 }
 0x228   : > { %v2376_v54 = vpop.eup %2375  ;;  %v1627_v32 = vsel %vm4448_vm9, %v1608_v17, 0.0  ;;  %v1851_v11 = vsel %vm4449_vm13, %v1832_v35, 0.0  ;;  %2391 = vlog2.f32 %v1172_v57  ;;  %v1179_v47 = vadd.f32 1.0, %v3535_v21 }
 0x229   : > { %v2378_v43 = vpop.eup %2377  ;;  %v3552_v33 = vsub.f32 %v1777_v62, %v1796_v48  ;;  %v1778_v36 = vmax.f32 %v3468_v63, 0.0  ;;  %vm1340_vm11 = vcmp.ge.f32.partialorder %v3381_v10, 0.0  ;;  %v2111_v24 = vunpack.c.l.bf16 %v3541_v37  ;;  %p2536_p2 = por %p2535_p0, %p2534_p10 }
 0x22a   : > { %v2380_v53 = vpop.eup %2379  ;;  %v1720_v5 = vadd.f32 1.0, %v2366_v52  ;;  %v3560_v39 = vmul.f32 %v1626_v60, %v3468_v63  ;;  %v3563_v1 = vmul.f32 %v1627_v32, %v3474_v6  ;;  %2393 = vrcp.f32 %v1176_v59 }
 0x22b   : > { %v2382_v40 = vpop.eup %2381  ;;  %v3565_v35 = vadd.f32 %v1868_v34, %v1851_v11  ;;  %v1833_v19 = vadd.f32 %v1814_v30, %v1754_v49  ;;  %2395 = vlog2.f32 %v1174_v26  ;;  %v978_v17 = vunpack.c.l.bf16 %v959_v51  ;;  %p2537_p4 = pnand %p2536_p2, %p2530_p8 }
 0x22c   : > { %v3557_v42 = vpop.eup %2383  ;;  %v3567_v62 = vsel %vm1340_vm11, %v2372_v56, %v1359_v7  ;;  %vm1342_vm14 = vcmp.ge.f32.partialorder %v3398_v14, 0.0  ;;  %v1361_v48 = vmul.f32 %v2380_v53, %v3503_v27  ;;  %2397 = vrcp.f32 %v1179_v47 }
 0x22d   : > { %v2386_v57 = vpop.eup %2385  ;;  %vm1343_vm15 = vcmp.ge.f32.partialorder %v3403_v15, 0.0  ;;  %v1362_v52 = vmul.f32 %v2382_v40, %v3507_v29  ;;  %v1182_v60 = vadd.f32 1.0, %v3557_v42  ;;  %vm4450_vm9 = vcmp.lt.s32.totalorder %v2957_v41, 300 }
 0x22e   : > { %v3576_v34 = vsel %vm4450_vm9, %v2111_v24, 0.0  ;;  %v1364_v26 = vmul.f32 %v2386_v57, %v3509_v44  ;;  %v1721_v30 = vadd.f32 1.0, %v2376_v54  ;;  %v1722_v56 = vadd.f32 1.0, %v2378_v43 }
 0x22f   : > { %2399 = vlog2.f32 %v1720_v5  ;;  %v2388_v49 = vpop.eup %2387  ;;  %vm4451_vm13 = vcmp.lt.s32.totalorder %v2910_v12, 300  ;;  %v1226_v32 = vmax.f32 %v3381_v10, 0.0  ;;  %vm1345_vm11 = vcmp.ge.f32.partialorder %v3415_v23, 0.0 }
 0x230   : > { %v1852_v27 = vsel %vm4451_vm13, %v1833_v19, 0.0  ;;  %vm4452_vm12 = vcmp.lt.s32.totalorder %v4436_v50, 300  ;;  %v2390_v11 = vpop.eup %2389  ;;  %v3589_v7 = vsel %vm1342_vm14, %v2380_v53, %v1361_v48  ;;  %v1109_v44 = vand.u32 2147483647, %v3576_v34 }
 0x231   : > { %v3585_v29 = vsel %vm4452_vm12, %v978_v17, 0.0  ;;  %v2080_v54 = vunpack.c.h.bf16 %v3354_v13  ;;  %2401 = vlog2.f32 %v1721_v30  ;;  %v3596_v51 = vsel %vm1343_vm15, %v2382_v40, %v1362_v52  ;;  %vm4453_vm15 = vmmov %vm4450_vm9 }
 0x232   : > { %2403 = vlog2.f32 %v1722_v56  ;;  %v2392_v24 = vpop.eup %2391  ;;  %v3598_v5 = vmul.f32 0.6931472, %v2388_v49  ;;  %v3600_v19 = vsel %vm1345_vm11, %v2386_v57, %v1364_v26  ;;  %v1111_v53 = vand.u32 2147483647, %v3585_v29 }
 0x233   : > { %2405 = vrcp.f32 %v1182_v60  ;;  %v3603_v17 = vmul.f32 0.6931472, %v2390_v11  ;;  %v1128_v52 = vsub.f32 0.0, %v1109_v44  ;;  %v3610_v56 = vsel %vm425_vm2, %v2080_v54, 0.0  ;;  %v3620_v44 = vpop.permute.xlu1 %1018 }
 0x234   : > { %2407 = vlog2.f32 %v1176_v59  ;;  %v2394_v30 = vpop.eup %2393  ;;  %v3612_v26 = vmul.f32 0.6931472, %v2392_v24  ;;  %v1130_v59 = vsub.f32 0.0, %v1111_v53  ;;  %v2087_v40 = vunpack.c.l.bf16 %v3384_v0 }
 0x235   : > { %2409 = vlog2.f32 %v1179_v47  ;;  %v2396_v57 = vpop.eup %2395  ;;  %v1779_v47 = vmax.f32 %v3474_v6, 0.0  ;;  %v1366_v24 = vmul.f32 %v2394_v30, %v3529_v38  ;;  %v1094_v49 = vand.u32 2147483647, %v3610_v56 }
 0x236   : > { %2411 = vlog2.f32 %v1182_v60  ;;  %v2398_v43 = vpop.eup %2397  ;;  %v3626_v60 = vmul.f32 0.6931472, %v2396_v57  ;;  %vm1347_vm12 = vcmp.ge.f32.partialorder %v3451_v4, 0.0  ;;  %v1816_v6 = vsub.f32 %v1778_v36, %v3560_v39 }
 0x237   : > { %2413 = vlog2.f32 %v3163_v22  ;;  %v1163_v22 = vmul.f32 1.442695, %v1128_v52  ;;  %v1167_v53 = vmul.f32 1.442695, %v1130_v59  ;;  %v3636_v54 = vsel %vm428_vm6, %v2087_v40, 0.0 }
 0x238   : > { %2415 = vlog2.f32 %v3179_v61  ;;  %v1369_v61 = vmul.f32 %v2398_v43, %v3535_v21  ;;  %v1870_v57 = vadd.f32 %v3565_v35, %v1852_v27  ;;  %v3644_v63 = vsel %vm1347_vm12, %v2394_v30, %v1366_v24 }
 0x239   : > { %v2400_v11 = vpop.eup %2399  ;;  %2417 = vlog2.f32 %v3181_v55  ;;  %v1817_v55 = vsub.f32 %v1779_v47, %v3563_v1  ;;  %vm1350_vm14 = vcmp.ge.f32.partialorder %v3464_v46, 0.0  ;;  %v3647_v1 = vpop.permute.xlu1 %1024  ;;  %v1097_v35 = vand.u32 2147483647, %v3636_v54 }
 0x23a   : > { %2419 = vlog2.f32 %v3194_v16  ;;  %v1756_v0 = vmul.f32 0.6931472, %v2400_v11  ;;  %v1113_v16 = vsub.f32 0.0, %v1094_v49  ;;  %vm1074_vm9 = vcmp.eq.s32.totalorder %v2988_v18, %v3620_v44 }
 0x23b   : > { %v2402_v38 = vpop.eup %2401  ;;  %2421 = vlog2.f32 %v3196_v2  ;;  %v2091_v2 = vunpack.c.l.bf16 %v3422_v25  ;;  %v3655_v47 = vsel %vm1350_vm14, %v2398_v43, %v1369_v61  ;;  %vm4454_vm13 = vcmp.lt.s32.totalorder %v4434_v9, 300 }
 0x23c   : > { %v2404_v52 = vpop.eup %2403  ;;  %v1758_v21 = vmul.f32 0.6931472, %v2402_v38  ;;  %v1834_v11 = vadd.f32 %v3552_v33, %v1756_v0  ;;  %2423 = vpow2.f32 %v1163_v22  ;;  %v1133_v22 = vmul.f32 1.442695, %v1113_v16  ;;  %v4455_v38 = vld [vmem:[#allocation20_spill] sm:$0xff] }
 0x23d   : > { %v2406_v48 = vpop.eup %2405  ;;  %v1760_v36 = vmul.f32 0.6931472, %v2404_v52  ;;  %2425 = vpow2.f32 %v1167_v53  ;;  %vm1353_vm11 = vcmp.ge.f32.partialorder %v4455_v38, 0.0  ;;  %v2160_v52 = vld [vmem:[%s3335_s17 + $0x20] sm:$0xff]   ;;  %vm4456_vm12 = vcmp.lt.s32.totalorder %v4436_v50, 300 }
 0x23e   : > { %v2408_v39 = vpop.eup %2407  ;;  %v1835_v27 = vadd.f32 %v1816_v6, %v1758_v21  ;;  %v1853_v33 = vsel %vm4453_vm15, %v1834_v11, 0.0  ;;  %v1372_v24 = vmul.f32 %v2406_v48, %v3557_v42  ;;  %v1245_v42 = vsel %vm1074_vm9, %v3381_v10, 0.0 }
 0x23f   : > { %v2410_v40 = vpop.eup %2409  ;;  %v1836_v30 = vadd.f32 %v1817_v55, %v1760_v36  ;;  %v1871_v49 = vadd.f32 %v1870_v57, %v1853_v33  ;;  %vm1076_vm14 = vcmp.eq.s32.totalorder %v2988_v18, %v3647_v1  ;;  %v1116_v43 = vsub.f32 0.0, %v1097_v35 }
 0x240   : > { %v2412_v59 = vpop.eup %2411  ;;  %v1854_v25 = vsel %vm4454_vm13, %v1835_v27, 0.0  ;;  %v3673_v16 = vsel %vm430_vm8, %v2091_v2, 0.0  ;;  %v3676_v11 = vmul.f32 0.6931472, %v2408_v39  ;;  %v3684_v35 = vsel %vm1353_vm11, %v2406_v48, %v1372_v24 }
 0x241   : > { %v2414_v0 = vpop.eup %2413  ;;  %v1855_v53 = vsel %vm4456_vm12, %v1836_v30, 0.0  ;;  %v1872_v55 = vadd.f32 %v1871_v49, %v1854_v25  ;;  %4458 = vst [vmem:[#allocation20_spill] sm:$0xff] %v3673_v16  ;;  %v3680_v25 = vpop.permute.xlu1 %1027  ;;  %2427 = vpow2.f32 %v1133_v22  ;;  %v2095_v2 = vunpack.c.l.bf16 %v2160_v52 }
 0x242   : > { %v2416_v57 = vpop.eup %2415  ;;  %v793_v49 = vmul.f32 0.6931472, %v2414_v0  ;;  %v1264_v6 = vsub.f32 %v1226_v32, %v1245_v42  ;;  %v1247_v39 = vsel %vm1076_vm14, %v3398_v14, 0.0  ;;  %v1139_v13 = vmul.f32 1.442695, %v1116_v43 }
 0x243   : > { %v2418_v21 = vpop.eup %2417  ;;  %v1873_v33 = vadd.f32 %v1872_v55, %v1855_v53  ;;  %v1099_v53 = vand.u32 2147483647, %v3673_v16  ;;  %v795_v27 = vmul.f32 0.6931472, %v2416_v57  ;;  %v3696_v22 = vmul.f32 0.6931472, %v2410_v40 }
 0x244   : > { %v2420_v30 = vpop.eup %2419  ;;  %v797_v24 = vmul.f32 0.6931472, %v2418_v21  ;;  %v3705_v50 = vmul.f32 0.6931472, %v2412_v59  ;;  %v3709_v36 = vsel %vm432_vm10, %v2095_v2, 0.0  ;;  %v1283_v21 = vadd.f32 %v1264_v6, %v3598_v5  ;;  %v4463_v59 = vld [vmem:[#allocation26_spill] sm:$0xff] }
 0x245   : > { %v1874_v55 = vmul.f32 2.6041667e-05, %v1873_v33  ;;  %v2422_v0 = vpop.eup %2421  ;;  %v799_v42 = vmul.f32 0.6931472, %v2420_v30  ;;  %v4459_v33 = vmax.f32 %v3398_v14, 0.0  ;;  %4461 = vst [vmem:[#allocation33_spill] sm:$0xff] %v3709_v36  ;;  %vm1077_vm15 = vcmp.eq.s32.totalorder %v2988_v18, %v3680_v25 }
 0x246   : > { %v3694_v48 = vpop.eup %2423  ;;  %v1118_v32 = vsub.f32 0.0, %v1099_v53  ;;  %v2096_v10 = vunpack.c.h.bf16 %v2160_v52  ;;  %v4462_v30 = vld [vmem:[#allocation23_spill] sm:$0xff]  ;;  %2429 = vpow2.f32 %v1139_v13  ;;  %v4464_v5 = vsub.f32 1.0, %v3567_v62  ;;  %v4465_v52 = vld [vmem:[#allocation24_spill] sm:$0xff] }
 0x247   : > { %2036 = vst [vmem:[%s3700_s15 + $0x10] sm:$0xff] %v1874_v55  ;;  %v1266_v57 = vsub.f32 %v4459_v33, %v1247_v39  ;;  %v3711_v40 = vpop.eup %2425  ;;  %v3716_v55 = vpop.permute.xlu1 %1033  ;;  %v3719_v14 = vadd.f32 %v793_v49, %v4462_v30  ;;  %v3722_v39 = vadd.f32 %v795_v27, %v4463_v59  ;;  %v1185_v2 = vadd.f32 1.0, %v3694_v48 }
 0x248   : > { %v801_v33 = vmul.f32 0.6931472, %v2422_v0  ;;  %v1416_v6 = vsel %vm1074_vm9, %v4464_v5, %v3567_v62  ;;  %v3732_v53 = vadd.f32 %v797_v24, %v4465_v52  ;;  %v1101_v49 = vand.u32 2147483647, %v3709_v36  ;;  %v4468_v5 = vld [vmem:[#allocation27_spill] sm:$0xff] }
 0x249   : > { %v1285_v30 = vadd.f32 %v1266_v57, %v3603_v17  ;;  %v4466_v27 = vsub.f32 1.0, %v3589_v7  ;;  %v1248_v0 = vsel %vm1077_vm15, %v3403_v15, 0.0  ;;  %v1187_v62 = vadd.f32 1.0, %v3711_v40 }
 0x24a   : > { %v1302_v59 = vsel %vm424_vm0, %v1283_v21, 0.0  ;;  %v3750_v52 = vadd.f32 %v799_v42, %v4468_v5  ;;  %v1143_v17 = vmul.f32 1.442695, %v1118_v32  ;;  %v3754_v43 = vsel %vm433_vm7, %v2096_v10, 0.0  ;;  %v4472_v42 = vld [vmem:[#allocation25_spill] sm:$0xff]  ;;  %v2163_v10 = vld [vmem:[%s3335_s17 + $0x38] sm:$0xff]  }
 0x24b   : > { %v1418_v13 = vsel %vm1076_vm14, %v4466_v27, %v3589_v7  ;;  %v3756_v61 = vpop.eup %2427  ;;  %v1454_v7 = vmul.f32 %v1416_v6, %v1416_v6  ;;  %vm1079_vm13 = vcmp.eq.s32.totalorder %v2988_v18, %v3716_v55  ;;  %2431 = vrcp.f32 %v1185_v2  ;;  %v4470_v27 = vld [vmem:[#allocation31_spill] sm:$0xff]  ;;  %v3768_v16 = vpop.permute.xlu1 %1039 }
 0x24c   : > { %v2100_v45 = vunpack.c.h.bf16 %v4470_v27  ;;  %v1456_v28 = vmul.f32 %v1418_v13, %v1418_v13  ;;  %v4471_v21 = vmax.f32 %v3403_v15, 0.0  ;;  %v3764_v5 = vadd.f32 %v801_v33, %v4472_v42  ;;  %v4474_v33 = vld [vmem:[#allocation32_spill] sm:$0xff] }
 0x24d   : > { %v1120_v32 = vsub.f32 0.0, %v1101_v49  ;;  %v1473_v57 = vmul.f32 %v1454_v7, %v1302_v59  ;;  %v1304_v36 = vsel %vm426_vm4, %v1285_v30, 0.0  ;;  %2433 = vrcp.f32 %v1187_v62 }
 0x24e   : > { %v1267_v24 = vsub.f32 %v4471_v21, %v1248_v0  ;;  %v1102_v6 = vand.u32 2147483647, %v3754_v43  ;;  %v1250_v15 = vsel %vm1079_vm13, %v3415_v23, 0.0  ;;  %v3776_v13 = vadd.f32 1.0, %v3756_v61 }
 0x24f   : > { %2435 = vpow2.f32 %v1143_v17  ;;  %v2103_v49 = vunpack.c.l.bf16 %v4474_v33  ;;  %v4391_v0 = vmov 0.75   ;;  %vm4475_vm0 = vcmp.lt.s32.totalorder %v2868_v58, 300 }
 0x250   : > { %v1435_v30 = vsel %vm1074_vm9, 0.25, %v4391_v0  ;;  %v1437_v59 = vsel %vm1076_vm14, 0.25, %v4391_v0  ;;  %2437 = vlog2.f32 %v1185_v2  ;;  %v3789_v7 = vsel %vm4475_vm0, %v2100_v45, 0.0  ;;  %v3799_v33 = vpop.eup %2429 }
 0x251   : > { %v1475_v27 = vmul.f32 %v1456_v28, %v1304_v36  ;;  %v1286_v17 = vadd.f32 %v1267_v24, %v3612_v26  ;;  %v4476_v21 = vsub.f32 1.0, %v3596_v51  ;;  %v1147_v42 = vmul.f32 1.442695, %v1120_v32  ;;  %v3823_v24 = vpop.permute.xlu1 %1048 }
 0x252   : > { %v3801_v1 = vmul.f32 %v1473_v57, %v1435_v30  ;;  %v1438_v28 = vsel %vm1077_vm15, 0.25, %v4391_v0  ;;  %v4477_v45 = vmax.f32 %v3415_v23, 0.0  ;;  %v1121_v36 = vsub.f32 0.0, %v1102_v6 }
 0x253   : > { %v1419_v44 = vsel %vm1077_vm15, %v4476_v21, %v3596_v51  ;;  %vm1081_vm4 = vcmp.eq.s32.totalorder %v2988_v18, %v3768_v16  ;;  %2439 = vrcp.f32 %v3776_v13  ;;  %v1104_v51 = vand.u32 2147483647, %v3789_v7 }
 0x254   : > { %v1269_v26 = vsub.f32 %v4477_v45, %v1250_v15  ;;  %vm4478_vm9 = vcmp.lt.s32.totalorder %v2920_v20, 300  ;;  %v1457_v57 = vmul.f32 %v1419_v44, %v1419_v44  ;;  %v4479_v25 = vsub.f32 1.0, %v3600_v19 }
 0x255   : > { %v3815_v2 = vsel %vm4478_vm9, %v2103_v49, 0.0  ;;  %2441 = vlog2.f32 %v1187_v62  ;;  %v2107_v32 = vunpack.c.l.bf16 %v2163_v10  ;;  %v3825_v6 = vmul.f32 %v1475_v27, %v1437_v59  ;;  %v2432_v21 = vpop.eup %2431 }
 0x256   : > { %v1421_v23 = vsel %vm1079_vm13, %v4479_v25, %v3600_v19  ;;  %v1305_v30 = vsel %vm427_vm1, %v1286_v17, 0.0  ;;  %v1173_v49 = vadd.f32 1.0, %v3799_v33  ;;  %2443 = vpow2.f32 %v1147_v42 }
 0x257   : > { %v1288_v44 = vadd.f32 %v1269_v26, %v3626_v60  ;;  %v1252_v19 = vsel %vm1081_vm4, %v3451_v4, 0.0  ;;  %v1149_v45 = vmul.f32 1.442695, %v1121_v36  ;;  %v1105_v62 = vand.u32 2147483647, %v3815_v2  ;;  %v3840_v42 = vpop.eup %2433  ;;  %v3863_v60 = vpop.permute.xlu1 %1057 }
 0x258   : > { %v1440_v59 = vsel %vm1079_vm13, 0.25, %v4391_v0  ;;  %v1459_v27 = vmul.f32 %v1421_v23, %v1421_v23  ;;  %v1123_v17 = vsub.f32 0.0, %v1104_v51  ;;  %v2108_v25 = vunpack.c.h.bf16 %v2163_v10 }
 0x259   : > { %v1476_v15 = vmul.f32 %v1457_v57, %v1305_v30  ;;  %vm1356_vm1 = vcmp.ge.f32.partialorder %v3576_v34, 0.0  ;;  %vm4481_vm11 = vcmp.lt.s32.totalorder %v2941_v31, 300  ;;  %v3848_v36 = vpop.eup %2435  ;;  %v4482_v20 = vmax.f32 %v3451_v4, 0.0 }
 0x25a   : > { %v3846_v26 = vsel %vm4481_vm11, %v2107_v32, 0.0  ;;  %v4483_v51 = vsub.f32 1.0, %v3644_v63  ;;  %v1375_v57 = vmul.f32 %v2432_v21, %v3694_v48  ;;  %2445 = vrcp.f32 %v1173_v49  ;;  %v2438_v23 = vpop.eup %2437  ;;  %vm4498_vm9 = vmmov %vm4481_vm11 }
 0x25b   : > { %v1271_v55 = vsub.f32 %v4482_v20, %v1252_v19  ;;  %v1307_v32 = vsel %vm429_vm3, %v1288_v44, 0.0  ;;  %vm1084_vm12 = vcmp.eq.s32.totalorder %v2988_v18, %v3823_v24  ;;  %2447 = vpow2.f32 %v1149_v45 }
 0x25c   : > { %v1423_v10 = vsel %vm1081_vm4, %v4483_v51, %v3644_v63  ;;  %v1124_v20 = vsub.f32 0.0, %v1105_v62  ;;  %v1153_v4 = vmul.f32 1.442695, %v1123_v17  ;;  %v1107_v19 = vand.u32 2147483647, %v3846_v26 }
 0x25d   : > { %vm4485_vm14 = vcmp.lt.s32.totalorder %v2910_v12, 300  ;;  %v2112_v48 = vunpack.c.h.bf16 %v3541_v37  ;;  %v3871_v51 = vmul.f32 %v1476_v15, %v1438_v28  ;;  %v1442_v44 = vsel %vm1081_vm4, 0.25, %v4391_v0  ;;  %v3878_v45 = vpop.eup %2439 }
 0x25e   : > { %v3868_v63 = vsel %vm4485_vm14, %v2108_v25, 0.0  ;;  %v1461_v30 = vmul.f32 %v1423_v10, %v1423_v10  ;;  %2449 = vlog2.f32 %v3776_v13  ;;  %v1290_v62 = vadd.f32 %v1271_v55, %v3676_v11  ;;  %vm4500_vm11 = vmmov %vm4485_vm14 }
 0x25f   : > { %vm1087_vm3 = vcmp.eq.s32.totalorder %v2988_v18, %v3863_v60  ;;  %v3883_v17 = vmul.f32 0.6931472, %v2438_v23  ;;  %v3887_v37 = vsel %vm1356_vm1, %v2432_v21, %v1375_v57  ;;  %v2442_v28 = vpop.eup %2441  ;;  %v1478_v25 = vmul.f32 %v1459_v27, %v1307_v32 }
 0x260   : > { %4487 = vst [vmem:[#allocation26_spill] sm:$0xff] %v3887_v37  ;;  %v1255_v16 = vsel %vm1084_vm12, %v3464_v46, 0.0  ;;  %v1155_v13 = vmul.f32 1.442695, %v1124_v20  ;;  %v1108_v15 = vand.u32 2147483647, %v3868_v63  ;;  %v3894_v11 = vpop.eup %2443  ;;  %2451 = vpow2.f32 %v1153_v4 }
 0x261   : > { %4486 = vst [vmem:[#allocation23_spill] sm:$0xff] %v3883_v17  ;;  %v1175_v55 = vadd.f32 1.0, %v3848_v36  ;;  %v1126_v10 = vsub.f32 0.0, %v1107_v19  ;;  %vm4488_vm15 = vcmp.lt.s32.totalorder %v4434_v9, 300  ;;  %v1258_v27 = vsel %vm1087_vm3, %v4455_v38, 0.0 }
 0x262   : > { %v3899_v21 = vsel %vm4488_vm15, %v2112_v48, 0.0  ;;  %vm1358_vm13 = vcmp.ge.f32.partialorder %v3585_v29, 0.0  ;;  %v1377_v23 = vmul.f32 %v3840_v42, %v3711_v40  ;;  %v1309_v20 = vsel %vm431_vm5, %v1290_v62, 0.0 }
 0x263   : > { %v4490_v4 = vmax.f32 %v3464_v46, 0.0  ;;  %v4491_v48 = vsub.f32 1.0, %v3655_v47  ;;  %2453 = vlog2.f32 %v1173_v49  ;;  %v1177_v57 = vadd.f32 1.0, %v3894_v11 }
 0x264   : > { %2455 = vpow2.f32 %v1155_v13  ;;  %v1127_v37 = vsub.f32 0.0, %v1108_v15  ;;  %v1110_v40 = vand.u32 2147483647, %v3899_v21  ;;  %v3921_v17 = vpop.eup %2445  ;;  %v3923_v62 = vmul.f32 %v1478_v25, %v1440_v59 }
 0x265   : > { %v1274_v19 = vsub.f32 %v4490_v4, %v1255_v16  ;;  %v1426_v0 = vsel %vm1084_vm12, %v4491_v48, %v3655_v47  ;;  %v4492_v46 = vmax.f32 %v4455_v38, 0.0  ;;  %2457 = vrcp.f32 %v1175_v55  ;;  %v3927_v58 = vpop.eup %2447 }
 0x266   : > { %v1159_v4 = vmul.f32 1.442695, %v1126_v10  ;;  %v4493_v47 = vmov 0.75   ;;  %v1464_v13 = vmul.f32 %v1426_v0, %v1426_v0  ;;  %v1480_v25 = vmul.f32 %v1461_v30, %v1309_v20 }
 0x267   : > { %v1277_v16 = vsub.f32 %v4492_v46, %v1258_v27  ;;  %v3933_v49 = vsel %vm1084_vm12, 0.25, %v4493_v47  ;;  %v1293_v38 = vadd.f32 %v1274_v19, %v3696_v22  ;;  %v3938_v27 = vmul.f32 0.6931472, %v2442_v28 }
 0x268   : > { %v3943_v10 = vsel %vm1358_vm13, %v3840_v42, %v1377_v23  ;;  %v2450_v48 = vpop.eup %2449  ;;  %vm4494_vm5 = vcmp.lt.s32.totalorder %v2889_v3, 300  ;;  %2459 = vrcp.f32 %v1177_v57  ;;  %v1161_v0 = vmul.f32 1.442695, %v1127_v37 }
 0x269   : > { %v1129_v46 = vsub.f32 0.0, %v1110_v40  ;;  %v1178_v28 = vadd.f32 1.0, %v3927_v58  ;;  %2461 = vpow2.f32 %v1159_v4  ;;  %vm1341_vm0 = vcmp.ge.f32.partialorder %v3610_v56, 0.0  ;;  %vm4499_vm1 = vmmov %vm4494_vm5 }
 0x26a   : > { %v3956_v37 = vmul.f32 %v1480_v25, %v1442_v44  ;;  %2463 = vlog2.f32 %v1175_v55  ;;  %vm4497_vm4 = vcmp.lt.s32.totalorder %v2901_v8, 300  ;;  %vm1344_vm12 = vcmp.ge.f32.partialorder %v3636_v54, 0.0 }
 0x26b   : > { %2465 = vpow2.f32 %v1161_v0  ;;  %v1165_v44 = vmul.f32 1.442695, %v1129_v46  ;;  %vm4501_vm14 = vcmp.lt.s32.totalorder %v2957_v41, 300 }
 0x26c   : > { %2467 = vrcp.f32 %v1178_v28 }
 0x26d   : > { %v869_v32 = vpop.xlane.xlu0 %868  ;;  %2469 = vlog2.f32 %v1177_v57 }
 0x26e   : > { %v893_v15 = vsub.f32 %v3719_v14, %v869_v32  ;;  %v1296_v14 = vadd.f32 %v1277_v16, %v3705_v50  ;;  %v4495_v32 = vld [vmem:[#allocation30_spill] sm:$0xff]  ;;  %v4496_v50 = vsub.f32 1.0, %v3684_v35  ;;  %2471 = vpow2.f32 %v1165_v44 }
 0x26f   : > { %2473 = vlog2.f32 %v1178_v28  ;;  %v1227_v28 = vmax.f32 %v3610_v56, 0.0 }
 0x270   : > { %v912_v24 = vsel %vm4494_vm5, %v893_v15, 0.0  ;;  %v3954_v15 = vpop.eup %2451  ;;  %v1429_v40 = vsel %vm1087_vm3, %v4496_v50, %v3684_v35  ;;  %v1315_v25 = vsel %vm4499_vm1, %v1296_v14, 0.0  ;;  %v1363_v35 = vmul.f32 %v3921_v17, %v3799_v33 }
 0x271   : > { %v930_v30 = vadd.f32 %v4495_v32, %v912_v24  ;;  %v873_v20 = vpop.xlane.xlu1 %872  ;;  %v871_v22 = vpop.xlane.xlu0 %870  ;;  %v1180_v0 = vadd.f32 1.0, %v3954_v15  ;;  %v1467_v46 = vmul.f32 %v1429_v40, %v1429_v40  ;;  %vm1352_vm1 = vcmp.ge.f32.partialorder %v3815_v2, 0.0 }
 0x272   : > { %v895_v19 = vsub.f32 %v3732_v53, %v873_v20  ;;  %v894_v42 = vsub.f32 %v3722_v39, %v871_v22  ;;  %v1360_v53 = vmul.f32 %v3878_v45, %v3756_v61  ;;  %v1312_v39 = vsel %vm4497_vm4, %v1293_v38, 0.0  ;;  %v2454_v4 = vpop.eup %2453 }
 0x273   : > { %v3974_v61 = vpop.eup %2455  ;;  %v3991_v57 = vsel %vm1344_vm12, %v3921_v17, %v1363_v35  ;;  %2475 = vrcp.f32 %v1180_v0  ;;  %v1191_v17 = vmul.f32 0.6931472, %v2450_v48  ;;  %vm1351_vm4 = vcmp.ge.f32.partialorder %v3789_v7, 0.0 }
 0x274   : > { %v913_v16 = vsel %vm4498_vm9, %v894_v42, 0.0  ;;  %v914_v8 = vsel %vm4500_vm11, %v895_v19, 0.0  ;;  %v2458_v3 = vpop.eup %2457  ;;  %v1379_v22 = vsel %vm1341_vm0, %v3878_v45, %v1360_v53  ;;  %v1448_v45 = vsel %vm1087_vm3, 0.25, %v4493_v47  ;;  %v4502_v53 = vld [vmem:[#allocation20_spill] sm:$0xff] }
 0x275   : > { %v931_v24 = vadd.f32 %v930_v30, %v913_v16  ;;  %v877_v32 = vpop.xlane.xlu1 %876  ;;  %v875_v20 = vpop.xlane.xlu0 %874  ;;  %v1483_v30 = vmul.f32 %v1464_v13, %v1312_v39  ;;  %v1365_v13 = vmul.f32 %v2458_v3, %v3848_v36  ;;  %vm1346_vm13 = vcmp.ge.f32.partialorder %v4502_v53, 0.0 }
 0x276   : > { %v897_v55 = vsub.f32 %v3764_v5, %v877_v32  ;;  %v896_v38 = vsub.f32 %v3750_v52, %v875_v20  ;;  %v1486_v5 = vmul.f32 %v1467_v46, %v1315_v25  ;;  %v1181_v52 = vadd.f32 1.0, %v3974_v61  ;;  %v2460_v42 = vpop.eup %2459 }
 0x277   : > { %v932_v14 = vadd.f32 %v931_v24, %v914_v8  ;;  %v3994_v40 = vpop.eup %2461  ;;  %v4005_v16 = vmul.f32 %v1483_v30, %v3933_v49  ;;  %v1398_v44 = vsub.f32 1.0, %v1379_v22  ;;  %v1230_v36 = vmax.f32 %v3636_v54, 0.0 }
 0x278   : > { %v915_v33 = vsel %vm4501_vm14, %v896_v38, 0.0  ;;  %v916_v50 = vsel %vm4488_vm15, %v897_v55, 0.0  ;;  %v2464_v25 = vpop.eup %2463  ;;  %v4008_v24 = vmul.f32 %v1486_v5, %v1448_v45  ;;  %v4010_v20 = vmul.f32 0.6931472, %v2454_v4  ;;  %v4503_v38 = vld [vmem:[#allocation22_spill] sm:$0xff]  ;;  %v4504_v4 = vld [vmem:[#allocation33_spill] sm:$0xff] }
 0x279   : > { %v933_v19 = vadd.f32 %v932_v14, %v915_v33  ;;  %v1401_v60 = vsub.f32 1.0, %v3991_v57  ;;  %2477 = vrcp.f32 %v1181_v52  ;;  %v4013_v35 = vpop.eup %2465  ;;  %v4016_v8 = vsel %vm1346_vm13, %v2458_v3, %v1365_v13 }
 0x27a   : > { %v1367_v49 = vmul.f32 %v2460_v42, %v3894_v11  ;;  %v1183_v48 = vadd.f32 1.0, %v3994_v40  ;;  %v2468_v55 = vpop.eup %2467  ;;  %v1232_v14 = vmax.f32 %v4502_v53, 0.0  ;;  %vm1348_vm5 = vcmp.ge.f32.partialorder %v4504_v4, 0.0 }
 0x27b   : > { %v4002_v39 = vadd.f32 %v933_v19, %v916_v50  ;;  %2479 = vlog2.f32 %v1180_v0  ;;  %v4023_v30 = vmul.f32 0.6931472, %v2464_v25  ;;  %v1234_v33 = vmax.f32 %v4504_v4, 0.0  ;;  %v2470_v3 = vpop.eup %2469 }
 0x27c   : > { %vm1349_vm0 = vcmp.ge.f32.partialorder %v3754_v43, 0.0  ;;  %2481 = vlog2.f32 %v1181_v52  ;;  %v1403_v5 = vsub.f32 1.0, %v4016_v8  ;;  %v4031_v13 = vpop.eup %2471  ;;  %v4034_v0 = vsel %vm1348_vm5, %v2460_v42, %v1367_v49 }
 0x27d   : > { %v613_v32 = vpop.permute.xlu0 %612  ;;  %v1368_v45 = vmul.f32 %v2468_v55, %v3927_v58  ;;  %2483 = vrcp.f32 %v1183_v48  ;;  %v2474_v52 = vpop.eup %2473  ;;  %v4045_v49 = vmul.f32 0.6931472, %v2470_v3  ;;  %v1405_v59 = vsub.f32 1.0, %v4034_v0 }
 0x27e   : > { %vm632_vm3 = vcmp.eq.s32.totalorder %v2988_v18, %v613_v32  ;;  %2485 = vlog2.f32 %v1183_v48  ;;  %vm1354_vm12 = vcmp.ge.f32.partialorder %v3846_v26, 0.0  ;;  %vm1355_vm14 = vcmp.ge.f32.partialorder %v3868_v63, 0.0 }
 0x27f   : > { %v841_v46 = vsel %vm632_vm3, %v4503_v38, 0.0  ;;  %v1184_v38 = vadd.f32 1.0, %v4013_v35  ;;  %vm1357_vm13 = vcmp.ge.f32.partialorder %v3899_v21, 0.0 }
 0x280   : > { %878 = vadd.xlane.f32.xlu0 %v841_v46  ;;  %v2476_v46 = vpop.eup %2475 }
 0x281   : > { %v1022_v11 = vpop.permute.xlu0 %1021  ;;  %2487 = vlog2.f32 %v1184_v38  ;;  %v1370_v50 = vmul.f32 %v2476_v46, %v3954_v15 }
 0x282   : > { %vm1075_vm9 = vcmp.eq.s32.totalorder %v2988_v18, %v1022_v11  ;;  %2489 = vrcp.f32 %v1184_v38 }
 0x283   : > { %v1246_v25 = vsel %vm1075_vm9, %v3610_v56, 0.0  ;;  %v1417_v42 = vsel %vm1075_vm9, %v1398_v44, %v1379_v22  ;;  %v1186_v22 = vadd.f32 1.0, %v4031_v13  ;;  %v2478_v44 = vpop.eup %2477 }
 0x284   : > { %v1265_v23 = vsub.f32 %v1227_v28, %v1246_v25  ;;  %v4053_v28 = vsel %vm1349_vm0, %v2468_v55, %v1368_v45  ;;  %v1455_v3 = vmul.f32 %v1417_v42, %v1417_v42  ;;  %v4059_v25 = vmul.f32 0.6931472, %v2474_v52 }
 0x285   : > { %v1031_v58 = vpop.permute.xlu0 %1030  ;;  %v2480_v45 = vpop.eup %2479  ;;  %2491 = vlog2.f32 %v1186_v22  ;;  %v1243_v52 = vmax.f32 %v3899_v21, 0.0 }
 0x286   : > { %v1284_v32 = vadd.f32 %v1265_v23, %v1191_v17  ;;  %vm1078_vm11 = vcmp.eq.s32.totalorder %v2988_v18, %v1031_v58  ;;  %v2482_v15 = vpop.eup %2481  ;;  %2493 = vrcp.f32 %v1186_v22 }
 0x287   : > { %v1249_v48 = vsel %vm1078_vm11, %v3636_v54, 0.0  ;;  %v1420_v55 = vsel %vm1078_vm11, %v1401_v60, %v3991_v57  ;;  %v1406_v54 = vsub.f32 1.0, %v4053_v28  ;;  %v1371_v57 = vmul.f32 %v2478_v44, %v3974_v61 }
 0x288   : > { %v1303_v23 = vsel %vm425_vm2, %v1284_v32, 0.0  ;;  %v1268_v17 = vsub.f32 %v1230_v36, %v1249_v48  ;;  %v1436_v36 = vsel %vm1075_vm9, 0.25, %v4493_v47  ;;  %v1458_v38 = vmul.f32 %v1420_v55, %v1420_v55  ;;  %v2484_v48 = vpop.eup %2483 }
 0x289   : > { %v1474_v42 = vmul.f32 %v1455_v3, %v1303_v23  ;;  %v1037_v19 = vpop.permute.xlu0 %1036  ;;  %v4081_v3 = vsel %vm1351_vm4, %v2476_v46, %v1370_v50  ;;  %v4093_v50 = vmul.f32 0.6931472, %v2482_v15  ;;  %v2486_v46 = vpop.eup %2485 }
 0x28a   : > { %v1287_v32 = vadd.f32 %v1268_v17, %v4010_v20  ;;  %vm1080_vm2 = vcmp.eq.s32.totalorder %v2988_v18, %v1037_v19 }
 0x28b   : > { %v1493_v60 = vmul.f32 %v1474_v42, %v1436_v36  ;;  %v1251_v56 = vsel %vm1080_vm2, %v4502_v53, 0.0  ;;  %v1422_v61 = vsel %vm1080_vm2, %v1403_v5, %v4016_v8  ;;  %v4091_v36 = vmul.f32 0.6931472, %v2480_v45  ;;  %v2488_v8 = vpop.eup %2487 }
 0x28c   : > { %v1306_v11 = vsel %vm428_vm6, %v1287_v32, 0.0  ;;  %v1270_v20 = vsub.f32 %v1232_v14, %v1251_v56  ;;  %v1408_v53 = vsub.f32 1.0, %v4081_v3  ;;  %v4100_v14 = vsel %vm1352_vm1, %v2478_v44, %v1371_v57  ;;  %v4117_v57 = vpop.permute.xlu1 %1066  ;;  %v2490_v58 = vpop.eup %2489 }
 0x28d   : > { %v1511_v17 = vadd.f32 %v1493_v60, %v3801_v1  ;;  %v1477_v55 = vmul.f32 %v1458_v38, %v1306_v11  ;;  %v1043_v42 = vpop.permute.xlu0 %1042  ;;  %v1460_v5 = vmul.f32 %v1422_v61, %v1422_v61  ;;  %v1373_v45 = vmul.f32 %v2484_v48, %v3994_v40 }
 0x28e   : > { %v1289_v23 = vadd.f32 %v1270_v20, %v4023_v30  ;;  %vm1082_vm6 = vcmp.eq.s32.totalorder %v2988_v18, %v1043_v42  ;;  %v1439_v30 = vsel %vm1078_vm11, 0.25, %v4493_v47  ;;  %v4120_v11 = vmul.f32 0.6931472, %v2486_v46 }
 0x28f   : > { %v1512_v1 = vadd.f32 %v1511_v17, %v3825_v6  ;;  %v1253_v22 = vsel %vm1082_vm6, %v4504_v4, 0.0  ;;  %v1424_v6 = vsel %vm1082_vm6, %v1405_v59, %v4034_v0  ;;  %v1496_v38 = vmul.f32 %v1477_v55, %v1439_v30  ;;  %v2492_v59 = vpop.eup %2491  ;;  %v4512_v55 = vld [vmem:[#allocation17_spill] sm:$0xff] }
 0x290   : > { %v1308_v32 = vsel %vm430_vm8, %v1289_v23, 0.0  ;;  %v1272_v44 = vsub.f32 %v1234_v33, %v1253_v22  ;;  %v1409_v4 = vsub.f32 1.0, %v4100_v14  ;;  %v4126_v33 = vmul.f32 0.6931472, %v2488_v8 }
 0x291   : > { %v1513_v60 = vadd.f32 %v1512_v1, %v3871_v51  ;;  %v1479_v40 = vmul.f32 %v1460_v5, %v1308_v32  ;;  %v1046_v56 = vpop.permute.xlu0 %1045  ;;  %v1462_v61 = vmul.f32 %v1424_v6, %v1424_v6  ;;  %v1392_v17 = vsel %vm1354_vm12, %v2484_v48, %v1373_v45  ;;  %v2494_v45 = vpop.eup %2493 }
 0x292   : > { %v1291_v20 = vadd.f32 %v1272_v44, %v4045_v49  ;;  %vm1083_vm8 = vcmp.eq.s32.totalorder %v2988_v18, %v1046_v56  ;;  %v1441_v49 = vsel %vm1080_vm2, 0.25, %v4493_v47  ;;  %v4509_v23 = vmax.f32 %v3754_v43, 0.0  ;;  %v4150_v32 = vpop.permute.xlu1 %1072 }
 0x293   : > { %v1514_v0 = vadd.f32 %v1513_v60, %v1496_v38  ;;  %v1254_v51 = vsel %vm1083_vm8, %v3754_v43, 0.0  ;;  %v1425_v1 = vsel %vm1083_vm8, %v1406_v54, %v4053_v28  ;;  %v1498_v22 = vmul.f32 %v1479_v40, %v1441_v49 }
 0x294   : > { %v1310_v46 = vsel %vm432_vm10, %v1291_v20, 0.0  ;;  %v1273_v8 = vsub.f32 %v4509_v23, %v1254_v51  ;;  %v1374_v48 = vmul.f32 %v2490_v58, %v4013_v35  ;;  %vm1090_vm15 = vcmp.eq.s32.totalorder %v2988_v18, %v4117_v57 }
 0x295   : > { %v1515_v5 = vadd.f32 %v1514_v0, %v3923_v62  ;;  %v1481_v30 = vmul.f32 %v1462_v61, %v1310_v46  ;;  %v1052_v15 = vpop.permute.xlu0 %1051  ;;  %v1411_v43 = vsub.f32 1.0, %v1392_v17  ;;  %v1463_v62 = vmul.f32 %v1425_v1, %v1425_v1 }
 0x296   : > { %v1292_v19 = vadd.f32 %v1273_v8, %v4059_v25  ;;  %vm1085_vm10 = vcmp.eq.s32.totalorder %v2988_v18, %v1052_v15  ;;  %v4155_v35 = vmul.f32 0.6931472, %v2492_v59  ;;  %v1443_v44 = vsel %vm1082_vm6, 0.25, %v4493_v47 }
 0x297   : > { %v1516_v28 = vadd.f32 %v1515_v5, %v1498_v22  ;;  %v1256_v54 = vsel %vm1085_vm10, %v3789_v7, 0.0  ;;  %v4511_v60 = vmax.f32 %v3789_v7, 0.0  ;;  %v1427_v40 = vsel %vm1085_vm10, %v1408_v53, %v4081_v3 }
 0x298   : > { %v1311_v6 = vsel %vm433_vm7, %v1292_v19, 0.0  ;;  %v1261_v20 = vsel %vm1090_vm15, %v3576_v34, 0.0  ;;  %v1500_v0 = vmul.f32 %v1481_v30, %v1443_v44  ;;  %vm1092_vm7 = vcmp.eq.s32.totalorder %v2988_v18, %v4150_v32 }
 0x299   : > { %v1275_v38 = vsub.f32 %v4511_v60, %v1256_v54  ;;  %v1517_v59 = vadd.f32 %v1516_v28, %v3956_v37  ;;  %v1482_v42 = vmul.f32 %v1463_v62, %v1311_v6  ;;  %v1055_v61 = vpop.permute.xlu0 %1054  ;;  %v1444_v7 = vsel %vm1083_vm8, 0.25, %v4493_v47  ;;  %v4516_v62 = vld [vmem:[#allocation19_spill] sm:$0xff] }
 0x29a   : > { %vm1086_vm3 = vcmp.eq.s32.totalorder %v2988_v18, %v1055_v61  ;;  %v1465_v49 = vmul.f32 %v1427_v40, %v1427_v40  ;;  %vm4513_vm5 = vcmp.lt.s32.totalorder %v4512_v55, 300  ;;  %v4514_v23 = vmax.f32 %v3815_v2, 0.0  ;;  %v4519_v6 = vld [vmem:[#allocation23_spill] sm:$0xff] }
 0x29b   : > { %v1294_v51 = vadd.f32 %v1275_v38, %v4091_v36  ;;  %v1518_v3 = vadd.f32 %v1517_v59, %v1500_v0  ;;  %v1501_v53 = vmul.f32 %v1482_v42, %v1444_v7  ;;  %v1257_v37 = vsel %vm1086_vm3, %v3815_v2, 0.0  ;;  %v4520_v38 = vld [vmem:[#allocation26_spill] sm:$0xff] }
 0x29c   : > { %v1276_v8 = vsub.f32 %v4514_v23, %v1257_v37  ;;  %v1428_v56 = vsel %vm1086_vm3, %v1409_v4, %v4100_v14  ;;  %v1393_v36 = vsel %vm1355_vm14, %v2490_v58, %v1374_v48  ;;  %v4515_v1 = vmax.f32 %v3576_v34, 0.0 }
 0x29d   : > { %v1313_v46 = vsel %vm4513_vm5, %v1294_v51, 0.0  ;;  %v1519_v22 = vadd.f32 %v1518_v3, %v1501_v53  ;;  %v1061_v19 = vpop.permute.xlu0 %1060  ;;  %v1376_v28 = vmul.f32 %v2494_v45, %v4031_v13  ;;  %v1263_v2 = vsel %vm1092_vm7, %v3585_v29, 0.0 }
 0x29e   : > { %v1280_v5 = vsub.f32 %v4515_v1, %v1261_v20  ;;  %v1484_v30 = vmul.f32 %v1465_v49, %v1313_v46  ;;  %v1446_v14 = vsel %vm1085_vm10, 0.25, %v4493_v47  ;;  %v1295_v4 = vadd.f32 %v1276_v8, %v4093_v50 }
 0x29f   : > { %vm1088_vm0 = vcmp.eq.s32.totalorder %v2988_v18, %v1061_v19  ;;  %v1520_v34 = vadd.f32 %v1519_v22, %v4005_v16  ;;  %v1466_v48 = vmul.f32 %v1428_v56, %v1428_v56  ;;  %vm4517_vm4 = vcmp.lt.s32.totalorder %v4516_v62, 300 }
 0x2a0   : > { %v1503_v58 = vmul.f32 %v1484_v30, %v1446_v14  ;;  %v1259_v13 = vsel %vm1088_vm0, %v3846_v26, 0.0  ;;  %v1314_v54 = vsel %vm4517_vm4, %v1295_v4, 0.0  ;;  %v4518_v44 = vmax.f32 %v3846_v26, 0.0 }
 0x2a1   : > { %v1430_v15 = vsel %vm1088_vm0, %v1411_v43, %v1392_v17  ;;  %v1412_v50 = vsub.f32 1.0, %v1393_v36  ;;  %v1299_v60 = vadd.f32 %v1280_v5, %v4519_v6  ;;  %v4521_v16 = vsub.f32 1.0, %v4520_v38  ;;  %v1064_v59 = vpop.permute.xlu0 %1063 }
 0x2a2   : > { %v1278_v25 = vsub.f32 %v4518_v44, %v1259_v13  ;;  %v1485_v20 = vmul.f32 %v1466_v48, %v1314_v54  ;;  %v1395_v0 = vsel %vm1357_vm13, %v2494_v45, %v1376_v28  ;;  %v4522_v26 = vmax.f32 %v3585_v29, 0.0 }
 0x2a3   : > { %v1432_v40 = vsel %vm1090_vm15, %v4521_v16, %v4520_v38  ;;  %v1447_v17 = vsel %vm1086_vm3, 0.25, %v4493_v47  ;;  %vm1089_vm9 = vcmp.eq.s32.totalorder %v2988_v18, %v1064_v59  ;;  %v1521_v7 = vadd.f32 %v1520_v34, %v1503_v58  ;;  %v4531_v38 = vld [vmem:[#allocation29_spill] sm:$0xff] }
 0x2a4   : > { %v1282_v42 = vsub.f32 %v4522_v26, %v1263_v2  ;;  %v1297_v43 = vadd.f32 %v1278_v25, %v4120_v11  ;;  %v1504_v51 = vmul.f32 %v1485_v20, %v1447_v17  ;;  %v1468_v3 = vmul.f32 %v1430_v15, %v1430_v15  ;;  %v4528_v2 = vld [vmem:[#allocation21_spill] sm:$0xff]  ;;  %v4532_v20 = vld [vmem:[#allocation28_spill] sm:$0xff] }
 0x2a5   : > { %v1260_v53 = vsel %vm1089_vm9, %v3868_v63, 0.0  ;;  %vm4523_vm1 = vcmp.lt.s32.totalorder %v2941_v31, 300  ;;  %v4524_v29 = vmax.f32 %v3868_v63, 0.0  ;;  %v1431_v61 = vsel %vm1089_vm9, %v1412_v50, %v1393_v36  ;;  %v1070_v8 = vpop.permute.xlu0 %1069 }
 0x2a6   : > { %v1316_v45 = vsel %vm4523_vm1, %v1297_v43, 0.0  ;;  %v1414_v37 = vsub.f32 1.0, %v1395_v0  ;;  %vm4525_vm11 = vcmp.lt.s32.totalorder %v2957_v41, 300  ;;  %v1470_v55 = vmul.f32 %v1432_v40, %v1432_v40 }
 0x2a7   : > { %v1279_v49 = vsub.f32 %v4524_v29, %v1260_v53  ;;  %v1318_v11 = vsel %vm4525_vm11, %v1299_v60, 0.0  ;;  %v1522_v46 = vadd.f32 %v1521_v7, %v1504_v51  ;;  %v1487_v23 = vmul.f32 %v1468_v3, %v1316_v45 }
 0x2a8   : > { %v1301_v56 = vadd.f32 %v1282_v42, %v3938_v27  ;;  %v1449_v31 = vsel %vm1088_vm0, 0.25, %v4493_v47  ;;  %vm1091_vm12 = vcmp.eq.s32.totalorder %v2988_v18, %v1070_v8  ;;  %v1469_v5 = vmul.f32 %v1431_v61, %v1431_v61 }
 0x2a9   : > { %v1298_v63 = vadd.f32 %v1279_v49, %v4126_v33  ;;  %v1523_v36 = vadd.f32 %v1522_v46, %v4008_v24  ;;  %v1506_v1 = vmul.f32 %v1487_v23, %v1449_v31  ;;  %v1262_v41 = vsel %vm1091_vm12, %v3899_v21, 0.0 }
 0x2aa   : > { %v4526_v22 = vsub.f32 1.0, %v3943_v10  ;;  %vm4527_vm2 = vcmp.lt.s32.totalorder %v2910_v12, 300  ;;  %v1281_v30 = vsub.f32 %v1243_v52, %v1262_v41  ;;  %v1433_v24 = vsel %vm1091_vm12, %v1414_v37, %v1395_v0 }
 0x2ab   : > { %v1317_v33 = vsel %vm4527_vm2, %v1298_v63, 0.0  ;;  %v1489_v19 = vmul.f32 %v1470_v55, %v1318_v11  ;;  %vm4529_vm6 = vcmp.lt.s32.totalorder %v4528_v2, 300  ;;  %v1450_v4 = vsel %vm1089_vm9, 0.25, %v4493_v47 }
 0x2ac   : > { %v1434_v27 = vsel %vm1092_vm7, %v4526_v22, %v3943_v10  ;;  %v1488_v28 = vmul.f32 %v1469_v5, %v1317_v33  ;;  %v1320_v14 = vsel %vm4529_vm6, %v1301_v56, 0.0  ;;  %v1300_v10 = vadd.f32 %v1281_v30, %v4155_v35  ;;  %vm4533_vm8 = vmmov %vm4529_vm6 }
 0x2ad   : > { %v1472_v34 = vmul.f32 %v1434_v27, %v1434_v27  ;;  %v1524_v12 = vadd.f32 %v1523_v36, %v1506_v1  ;;  %v1471_v21 = vmul.f32 %v1433_v24, %v1433_v24  ;;  %v1451_v52 = vsel %vm1090_vm15, 0.25, %v4493_v47 }
 0x2ae   : > { %v1507_v58 = vmul.f32 %v1488_v28, %v1450_v4  ;;  %vm4530_vm14 = vcmp.lt.s32.totalorder %v4434_v9, 300  ;;  %v1508_v13 = vmul.f32 %v1489_v19, %v1451_v52  ;;  %v1452_v35 = vsel %vm1091_vm12, 0.25, %v4493_v47 }
 0x2af   : > { %v1319_v48 = vsel %vm4530_vm14, %v1300_v10, 0.0  ;;  %v1491_v62 = vmul.f32 %v1472_v34, %v1320_v14  ;;  %v1453_v57 = vsel %vm1092_vm7, 0.25, %v4493_v47  ;;  %2495 = vlog2.f32 %v4531_v38 }
 0x2b0   : > { %v1525_v54 = vadd.f32 %v1524_v12, %v1507_v58  ;;  %v1490_v44 = vmul.f32 %v1471_v21, %v1319_v48  ;;  %vm937_vm15 = vcmp.eq.s32.totalorder %v2988_v18, 0 }
 0x2b1   : > { %v1510_v50 = vmul.f32 %v1491_v62, %v1453_v57 }
 0x2b2   : > { %v1526_v25 = vadd.f32 %v1525_v54, %v1508_v13  ;;  %v1509_v15 = vmul.f32 %v1490_v44, %v1452_v35 }
 0x2b4   : > { %v1527_v9 = vadd.f32 %v1526_v25, %v1509_v15 }
 0x2b6   : > { %v1528_v6 = vadd.f32 %v1527_v9, %v1510_v50 }
 0x2b8   : > { %v1529_v60 = vmul.f32 2.6041667e-05, %v1528_v6 }
 0x2b9   : > { %v2496_v16 = vpop.eup %2495 }
 0x2ba   : > { %2035 = vst [vmem:[%s3700_s15 + $0x8] sm:$0xff] %v1529_v60  ;;  %v803_v40 = vmul.f32 0.6931472, %v2496_v16 }
 0x2bc   : > { %v822_v59 = vadd.f32 %v803_v40, %v4532_v20 }
 0x30d   : > { %v879_v0 = vpop.xlane.xlu0 %878 }
 0x30e   : > { %v898_v26 = vsub.f32 %v822_v59, %v879_v0 }
 0x310   : > { %v917_v47 = vsel %vm4533_vm8, %v898_v26, 0.0 }
 0x311   : > { %v935_v32 = vadd.f32 %v4002_v39, %v917_v47 }
 0x313   : > { %v936_v42 = vmul.f32 0.0033333334, %v935_v32 }
 0x315   : > { %v938_v17 = vsel %vm937_vm15, %v936_v42, 0.0 }
 0x316   : > { %940 = vst [vmem:[%s3700_s15] sm:$0xff] %v938_v17 }
 0x317   : > { %2540 = shalt.err (!%p2537_p4)
}
 0x318   : > { %s2541_s16 = scalar_lea.hbm %s4295_s29, 384  ;;  %s2545_s13 = scalar_lea.hbm %s4346_s6, 768 }
 0x319   : > { %p2542_p5 = scmp.ne.s32.totalorder %s4295_s29, %s2541_s16  ;;  %p2546_p1 = scmp.lt.u32.totalorder %s4295_s29, %s4346_s6 }
 0x31a   : > { %p2547_p3 = scmp.lt.u32.totalorder %s2545_s13, %s2541_s16  ;;  %p2549_p6 = scmp.lt.u32.totalorder %s2541_s16, %s4295_s29 }
 0x31b   : > { %p2543_p7 = pnand %p2542_p5, %p4534_p12 }
 0x31c   : > { %p2548_p11 = por %p2547_p3, %p2546_p1 }
 0x31d   : > { %p2544_p9 = pneg %p2543_p7 }
 0x31e   : > { %p2550_p13 = por %p2549_p6, %p2548_p11 }
 0x320   : > { %p2551_p8 = pnand %p2550_p13, %p2544_p9 }
 0x322   : > { %2554 = shalt.err (!%p2551_p8)
}
 0x323   : > { %s2601_s20 = smov 128   ;;  %s2602_s26 = smov 8  }
 0x324   : > { %2179 = dma.vmem_to_hbm [thread:$0]  (%p4534_p12), %s4290_s10, 384, %s4295_s29, %s1879_s11, %s2601_s20, %s2601_s20, %s2602_s26  }
 0x325 PF: > { %s1907_s18 = sand.u32 1, %s2581_s21   ;;  %p4535_p10 = scmp.ne.s32.totalorder %s4398_s9, 0 }
 0x326   : > { %p4536_p0 = scmp.ge.s32.totalorder %s2593_s24, 2  ;;  %s1908_s25 = scalar_lea.sflag [#allocation4], %s1907_s18 }
 0x328   : > { %p2186_p2 = pnand %p4536_p0, %p4535_p10 }
 0x32a   : > { %2576 = dma.done.wait (!%p2186_p2), %s1908_s25, 384  }
 0x32b   : > { %2578 = vsyncadd (!%p2186_p2), %s1908_s25, 4294966912  ;;  %p19_p4 = scmp.ge.s32.totalorder %s2663_s27, 4   ;;  %s4537_s21 = smov %s2585_s22 }
 0x32c   : > { %s4538_s22 = smov %s2589_s23  ;;  %s4539_s23 = smov %s2675_s30 }
 0x32d   : > { %s4540_s24 = smov %s2663_s27  ;;  %21 = sbr.rel (!%p19_p4) target bundleno = 5 (0x5), region = 106 }
 0x334   :  { %1913 = vsyncpa [#allocation3], 1 }
 0x335   :  { %1915 = vsyncpa [#allocation3 + $0x1], 1 }
 0x336   :  { %1916 = vsyncpa [#allocation4], 1 }
 0x337   :  { %1918 = vsyncpa [#allocation4 + $0x1], 1 }

</bundles_post_ra>
